<compile_context>
chip_gen: v7x
topology: tpu7x:2x2x1
jax: 0.10.0
libtpu: 0.0.40
codegen_flags: <defaults>
</compile_context>

<pallas_src>
import functools

import jax
import jax.numpy as jnp
import numpy as np
from jax import lax
from jax.experimental import pallas as pl
from jax.experimental.pallas import tpu as pltpu


def _upblock_kernel(x_ref, ah_ref, awt_ref, w0_ref, w1_ref, ws_ref, alpha_ref,
                    o_ref, xp_ref, slab_ref):
    # x_ref    : (1, Cin, H, W)     original input image (stream dtype)
    # ah_ref   : (Hp, H)            padded H-interp matrix (rows 0 / Hp-1 zero == conv pad)
    # awt_ref  : (W, Wp)            padded W-interp matrix, pre-transposed
    # w0_ref   : (Cout, 9*Cin+1)    conv0 3x3 weights as LHS, last column = bias
    # w1_ref   : (Cout, Cout)       conv1 1x1 weights as LHS (stream dtype)
    # ws_ref   : (Cout, Cin)        skip 1x1 weights as LHS (f32 for accuracy)
    # alpha_ref: (1,) f32 in SMEM   shared PReLU parameter
    # o_ref    : (1, Cout, T*W2)    lane-dense output row-tile
    # xp_ref   : (Cin, T+2, Wp) f32 VMEM scratch: padded upsampled row-tile
    # slab_ref : (9*Cin+1, T*W2)    VMEM scratch: conv0 tap slab (+ ones row for the bias)
    _, Cin, H, W = x_ref.shape
    Wp = awt_ref.shape[1]
    W2 = Wp - 2
    Cout, MT = o_ref.shape[1], o_ref.shape[2]
    T = MT // W2                       # output rows in this tile
    Hq = T + 2                         # padded rows needed (1-row halo each side)
    dt = x_ref.dtype
    nine_cin = 9 * Cin

    # Padded-row window of this tile: output rows [r*T, (r+1)*T) need padded rows [r*T, r*T+T+2).
    r = pl.program_id(1)
    row0 = r * T
    if T % 8 == 0:
        row0 = pl.multiple_of(row0, 8)
    ah = ah_ref[pl.ds(row0, Hq), :]                                     # (Hq, H)

    # Fused bilinear x2 upsample + zero halo: xp[c,p,q] = sum_{h,w} ah[p,h] * x[c,h,w] * awt[w,q].
    x2d = x_ref[0].reshape(Cin * H, W)
    xw = jnp.dot(x2d, awt_ref[...],
                 preferred_element_type=jnp.float32).astype(dt)         # (Cin*H, Wp)
    for c in range(Cin):                                                # Cin small, unrolled
        xp_ref[c] = jnp.dot(ah, xw[c * H:(c + 1) * H, :],
                            preferred_element_type=jnp.float32)         # (Hq, Wp) f32

    # conv0 (3x3, pad 1): pack the 9 taps (+ ones row folding the bias) into one slab and do a
    # single (Cout, 9*Cin+1) @ (9*Cin+1, MT) MXU dot with f32 accumulation.
    for kh in range(3):
        for kw in range(3):
            k = kh * 3 + kw
            tap = xp_ref[:, kh:kh + T, kw:kw + W2].reshape(Cin, MT)
            slab_ref[k * Cin:(k + 1) * Cin, :] = tap.astype(dt)
    slab_ref[nine_cin:nine_cin + 1, :] = jnp.ones((1, MT), dt)
    y0 = jnp.dot(w0_ref[...], slab_ref[...],
                 preferred_element_type=jnp.float32)                    # (Cout, MT) f32

    # PReLU with a single shared parameter (nn.PReLU() default), f32 elementwise.
    a = alpha_ref[0]
    y1 = jnp.where(y0 > 0, y0, a * y0)

    # conv1 (1x1, no bias) stays on the bf16 MXU path; skip 1x1 conv kept f32 (K=Cin, negligible).
    y2 = jnp.dot(w1_ref[...], y1.astype(dt), preferred_element_type=jnp.float32)
    cen = xp_ref[:, 1:1 + T, 1:1 + W2].reshape(Cin, MT)                 # f32 center tap
    sk = jnp.dot(ws_ref[...], cen, preferred_element_type=jnp.float32)

    o_ref[0] = (y2 + sk).astype(o_ref.dtype)                            # lane-dense, no transpose


def _interp_matrix_padded(n_in, n_out, pad):
    """Dense (n_out + 2*pad, n_in) bilinear interpolation matrix (align_corners=True) with
    `pad` all-zero border rows (these double as the 3x3 conv's zero padding)."""
    A = np.zeros((n_out + 2 * pad, n_in), np.float32)
    if n_out == 1:
        src = np.zeros((1,), np.float64)
    else:
        src = np.arange(n_out, dtype=np.float64) * (n_in - 1) / (n_out - 1)
    lo = np.clip(np.floor(src).astype(np.int64), 0, n_in - 1)
    hi = np.minimum(lo + 1, n_in - 1)
    frac = (src - lo).astype(np.float32)
    rows = np.arange(n_out) + pad
    A[rows, lo] += 1.0 - frac
    A[rows, hi] += frac
    return jnp.asarray(A)


def _pick_row_tiles(H2, W2, desired):
    """Largest row-tile count <= desired s.t. H2 divides evenly and the output block stays
    a multiple of 128 lanes (keeps stores unmasked and satisfies the (8,128) rule)."""
    rt = max(1, int(desired))
    while rt > 1:
        if H2 % rt == 0 and ((H2 // rt) * W2) % 128 == 0:
            return rt
        rt -= 1
    return 1


def upblock_forward(x_nchw, params, *, stream_dtype=jnp.bfloat16, row_tiles=2):
    # row_tiles=2 gives >=2 grid steps per TensorCore on v7x (DMA/compute overlap); on v5e/v6e a
    # coarser grid (row_tiles=1) is also fine at small H*W since per-step overhead is ~0.35us.
    w0, b0, alpha, w1, ws = (params["w0"], params["b0"], params["alpha"],
                             params["w1"], params["ws"])
    N, Cin, H, W = x_nchw.shape
    Cout = w0.shape[-1]
    H2, W2 = 2 * H, 2 * W
    Hp, Wp = H2 + 2, W2 + 2

    RT = _pick_row_tiles(H2, W2, row_tiles)
    T = H2 // RT

    # Tiny padded interpolation matrices (upsample + conv halo are fused into the kernel).
    ah = _interp_matrix_padded(H, H2, 1).astype(stream_dtype)           # (Hp, H)
    awt = _interp_matrix_padded(W, W2, 1).T.astype(stream_dtype)        # (W, Wp)

    # Pack weights for lane-dense (Cout, M) compute (weights as LHS), bias as an extra column.
    w0_lhs = jnp.concatenate([w0.reshape(9 * Cin, Cout).T, b0.reshape(Cout, 1)],
                             axis=1).astype(stream_dtype)               # (Cout, 9*Cin+1)
    w1_lhs = w1.T.astype(stream_dtype)                                  # (Cout, Cout)
    ws_lhs = ws.T.astype(jnp.float32)                                   # (Cout, Cin), f32 skip
    alpha1 = alpha.reshape(1).astype(jnp.float32)                       # SMEM scalar
    x_s = x_nchw.astype(stream_dtype)

    out = pl.pallas_call(
        _upblock_kernel,
        out_shape=jax.ShapeDtypeStruct((N, Cout, H2 * W2), x_nchw.dtype),
        grid_spec=pltpu.PrefetchScalarGridSpec(
            num_scalar_prefetch=0,
            grid=(N, RT),
            in_specs=[
                pl.BlockSpec((1, Cin, H, W), lambda n, r: (n, 0, 0, 0)),    # original image
                pl.BlockSpec((Hp, H), lambda n, r: (0, 0)),                 # H-interp (padded)
                pl.BlockSpec((W, Wp), lambda n, r: (0, 0)),                 # W-interp (padded, T)
                pl.BlockSpec((Cout, 9 * Cin + 1), lambda n, r: (0, 0)),     # conv0 w + bias
                pl.BlockSpec((Cout, Cout), lambda n, r: (0, 0)),            # conv1 w
                pl.BlockSpec((Cout, Cin), lambda n, r: (0, 0)),             # skip w (f32)
                pl.BlockSpec(memory_space=pltpu.MemorySpace.SMEM),          # PReLU alpha
            ],
            out_specs=pl.BlockSpec((1, Cout, T * W2), lambda n, r: (n, 0, r)),
            scratch_shapes=[
                pltpu.VMEM((Cin, T + 2, Wp), jnp.float32),                  # padded upsampled tile
                pltpu.VMEM((9 * Cin + 1, T * W2), stream_dtype),            # conv0 tap slab
            ],
        ),
        compiler_params=pltpu.CompilerParams(
            dimension_semantics=("parallel", "parallel"),
            vmem_limit_bytes=32 * 1024 * 1024),
    )(x_s, ah, awt, w0_lhs, w1_lhs, ws_lhs, alpha1)

    return out.reshape(N, Cout, H2, W2)                                  # already NCHW


# ----------------------------- plain-JAX reference --------------------------------
def bilinear_upsample_x2_align_corners(x_nhwc):
    """Gather-based F.interpolate(scale_factor=2, mode='bilinear', align_corners=True).
    Intentionally a *different* implementation than the matrix-based one in the forward path."""
    N, H, W, C = x_nhwc.shape
    Ho, Wo = 2 * H, 2 * W

    def axis_weights(n_in, n_out):
        i = jnp.arange(n_out, dtype=jnp.float32)
        if n_out == 1:
            src = jnp.zeros((1,), jnp.float32)
        else:
            src = i * (n_in - 1) / (n_out - 1)
        lo = jnp.clip(jnp.floor(src).astype(jnp.int32), 0, n_in - 1)
        hi = jnp.minimum(lo + 1, n_in - 1)
        frac = (src - lo.astype(jnp.float32)).astype(x_nhwc.dtype)
        return lo, hi, frac

    hl, hh, hf = axis_weights(H, Ho)
    wl, wh, wf = axis_weights(W, Wo)
    xh = (x_nhwc[:, hl] * (1.0 - hf)[None, :, None, None]
          + x_nhwc[:, hh] * hf[None, :, None, None])
    xhw = (xh[:, :, wl] * (1.0 - wf)[None, None, :, None]
           + xh[:, :, wh] * wf[None, None, :, None])
    return xhw


def upblock_reference(x_nchw, params):
    w0, b0, alpha, w1, ws = (params["w0"], params["b0"], params["alpha"],
                             params["w1"], params["ws"])
    x = jnp.transpose(x_nchw, (0, 2, 3, 1))
    xup = bilinear_upsample_x2_align_corners(x)
    y0 = lax.conv_general_dilated(
        xup, w0, window_strides=(1, 1), padding=((1, 1), (1, 1)),
        dimension_numbers=("NHWC", "HWIO", "NHWC"),
        precision=lax.Precision.HIGHEST) + b0[None, None, None, :]
    y1 = jnp.where(y0 > 0, y0, alpha[0] * y0)
    y2 = lax.conv_general_dilated(
        y1, w1[None, None], (1, 1), "VALID",
        dimension_numbers=("NHWC", "HWIO", "NHWC"), precision=lax.Precision.HIGHEST)
    sk = lax.conv_general_dilated(
        xup, ws[None, None], (1, 1), "VALID",
        dimension_numbers=("NHWC", "HWIO", "NHWC"), precision=lax.Precision.HIGHEST)
    return jnp.transpose(y2 + sk, (0, 3, 1, 2))


if __name__ == "__main__":
    # UpBlock(in_size=4, out_size=8, norm=None); input (N=2, C=4, H=16, W=16)
    Cin, Cout = 4, 8
    key = jax.random.PRNGKey(0)
    k0, k1, k2, k3, kx = jax.random.split(key, 5)

    params = {
        # conv0: nn.Conv2d(Cin, Cout, 3, 1, 1, bias=True) -> HWIO weights
        "w0": jax.random.normal(k0, (3, 3, Cin, Cout), jnp.float32) * 0.1,
        "b0": jax.random.normal(k1, (Cout,), jnp.float32) * 0.05,
        # nn.PReLU() default: one shared parameter initialized to 0.25
        "alpha": jnp.array([0.25], dtype=jnp.float32),
        # conv1: nn.Conv2d(Cout, Cout, 1, 1, bias=False) as (I, O)
        "w1": jax.random.normal(k2, (Cout, Cout), jnp.float32) * 0.1,
        # skip: nn.Conv2d(Cin, Cout, 1, stride=1, bias=False) as (I, O)
        "ws": jax.random.normal(k3, (Cin, Cout), jnp.float32) * 0.1,
    }

    x = jax.random.normal(kx, (2, Cin, 16, 16), jnp.float32)

    ref = jax.block_until_ready(upblock_reference(x, params))
    fwd = jax.jit(upblock_forward, static_argnames=("stream_dtype", "row_tiles"))

    # f32-streaming path: tight check against the independent reference.
    out_f32 = jax.block_until_ready(fwd(x, params, stream_dtype=jnp.float32))
    assert out_f32.shape == (2, Cout, 32, 32), out_f32.shape
    np.testing.assert_allclose(np.asarray(out_f32), np.asarray(ref),
                               rtol=1e-3, atol=1e-4)

    # bf16-streaming path (default; halves HBM traffic on the main input): looser tolerance.
    out_bf16 = jax.block_until_ready(fwd(x, params))
    assert out_bf16.shape == (2, Cout, 32, 32), out_bf16.shape
    np.testing.assert_allclose(np.asarray(out_bf16), np.asarray(ref),
                               rtol=3e-2, atol=3e-2)

    print("KERNEL_OK")
</pallas_src>

<mosaic_0001>
module attributes {stable_mosaic.version = 11 : i64} {
  func.func @_upblock_kernel(%arg0: i32, %arg1: i32, %arg2: memref<1x4x16x16xf32, #tpu.memory_space<vmem>>, %arg3: memref<34x16xf32, #tpu.memory_space<vmem>>, %arg4: memref<16x34xf32, #tpu.memory_space<vmem>>, %arg5: memref<8x37xf32, #tpu.memory_space<vmem>>, %arg6: memref<8x8xf32, #tpu.memory_space<vmem>>, %arg7: memref<8x4xf32, #tpu.memory_space<vmem>>, %arg8: memref<1xf32, #tpu.memory_space<smem>>, %arg9: memref<1x8x512xf32, #tpu.memory_space<vmem>>, %arg10: memref<4x18x34xf32, #tpu.memory_space<vmem>>, %arg11: memref<37x512xf32, #tpu.memory_space<vmem>>) attributes {dimension_semantics = [#tpu.dimension_semantics<parallel>, #tpu.dimension_semantics<parallel>], iteration_bounds = array<i64: 2, 2>, scalar_prefetch = 0 : i64, scratch_operands = 2 : i64, tpu.core_type = #tpu.core_type<tc>, window_params = [{transform_indices = @transform_0, window_bounds = array<i64: 1, 4, 16, 16>}, {pipeline_mode = #tpu.pipeline_mode<synchronous>, transform_indices = @transform_1, window_bounds = array<i64: 34, 16>}, {pipeline_mode = #tpu.pipeline_mode<synchronous>, transform_indices = @transform_2, window_bounds = array<i64: 16, 34>}, {pipeline_mode = #tpu.pipeline_mode<synchronous>, transform_indices = @transform_3, window_bounds = array<i64: 8, 37>}, {pipeline_mode = #tpu.pipeline_mode<synchronous>, transform_indices = @transform_4, window_bounds = array<i64: 8, 8>}, {pipeline_mode = #tpu.pipeline_mode<synchronous>, transform_indices = @transform_5, window_bounds = array<i64: 8, 4>}, {transform_indices = @transform_6, window_bounds = array<i64: 1>}, {transform_indices = @transform_7, window_bounds = array<i64: 1, 8, 512>}]} {
    %c16_i32 = arith.constant 16 : i32
    %0 = arith.muli %arg1, %c16_i32 : i32
    %1 = tpu.assume_multiple %0, 8 : i32
    %2 = arith.index_cast %1 : i32 to index
    %c0 = arith.constant 0 : index
    %3 = vector.load %arg3[%2, %c0] : memref<34x16xf32, #tpu.memory_space<vmem>>, vector<18x16xf32>
    %c0_0 = arith.constant 0 : index
    %c0_1 = arith.constant 0 : index
    %c0_2 = arith.constant 0 : index
    %c0_3 = arith.constant 0 : index
    %4 = vector.load %arg2[%c0_0, %c0_1, %c0_2, %c0_3] : memref<1x4x16x16xf32, #tpu.memory_space<vmem>>, vector<1x4x16x16xf32>
    %5 = vector.shape_cast %4 : vector<1x4x16x16xf32> to vector<4x16x16xf32>
    %6 = vector.shape_cast %5 : vector<4x16x16xf32> to vector<64x16xf32>
    %c0_4 = arith.constant 0 : index
    %c0_5 = arith.constant 0 : index
    %7 = vector.load %arg4[%c0_4, %c0_5] : memref<16x34xf32, #tpu.memory_space<vmem>>, vector<16x34xf32>
    %cst = arith.constant dense<0.000000e+00> : vector<64x34xf32>
    %8 = tpu.matmul %6, %7, %cst {dimension_numbers = #tpu.dot_dimension_numbers<[1], [0], [0], [1], [0, 0, 1, 1], [], []>} : vector<64x16xf32>, vector<16x34xf32>, vector<64x34xf32> -> vector<64x34xf32>
    %9 = vector.extract_strided_slice %8 {offsets = [0, 0], sizes = [16, 34], strides = [1, 1]} : vector<64x34xf32> to vector<16x34xf32>
    %cst_6 = arith.constant dense<0.000000e+00> : vector<18x34xf32>
    %10 = tpu.matmul %3, %9, %cst_6 {dimension_numbers = #tpu.dot_dimension_numbers<[1], [0], [0], [1], [0, 0, 1, 1], [], []>} : vector<18x16xf32>, vector<16x34xf32>, vector<18x34xf32> -> vector<18x34xf32>
    %c0_7 = arith.constant 0 : index
    %c0_8 = arith.constant 0 : index
    %c0_9 = arith.constant 0 : index
    %11 = vector.load %arg10[%c0_7, %c0_8, %c0_9] : memref<4x18x34xf32, #tpu.memory_space<vmem>>, vector<1x18x34xf32>
    %12 = vector.shape_cast %11 : vector<1x18x34xf32> to vector<18x34xf32>
    %13 = vector.shape_cast %10 : vector<18x34xf32> to vector<1x18x34xf32>
    tpu.vector_store %arg10[%c0_7, %c0_8, %c0_9], %13 {strides = array<i32>} : memref<4x18x34xf32, #tpu.memory_space<vmem>>, vector<1x18x34xf32>,
    %14 = vector.extract_strided_slice %8 {offsets = [16, 0], sizes = [16, 34], strides = [1, 1]} : vector<64x34xf32> to vector<16x34xf32>
    %cst_10 = arith.constant dense<0.000000e+00> : vector<18x34xf32>
    %15 = tpu.matmul %3, %14, %cst_10 {dimension_numbers = #tpu.dot_dimension_numbers<[1], [0], [0], [1], [0, 0, 1, 1], [], []>} : vector<18x16xf32>, vector<16x34xf32>, vector<18x34xf32> -> vector<18x34xf32>
    %c1 = arith.constant 1 : index
    %c0_11 = arith.constant 0 : index
    %c0_12 = arith.constant 0 : index
    %16 = vector.load %arg10[%c1, %c0_11, %c0_12] : memref<4x18x34xf32, #tpu.memory_space<vmem>>, vector<1x18x34xf32>
    %17 = vector.shape_cast %16 : vector<1x18x34xf32> to vector<18x34xf32>
    %18 = vector.shape_cast %15 : vector<18x34xf32> to vector<1x18x34xf32>
    tpu.vector_store %arg10[%c1, %c0_11, %c0_12], %18 {strides = array<i32>} : memref<4x18x34xf32, #tpu.memory_space<vmem>>, vector<1x18x34xf32>,
    %19 = vector.extract_strided_slice %8 {offsets = [32, 0], sizes = [16, 34], strides = [1, 1]} : vector<64x34xf32> to vector<16x34xf32>
    %cst_13 = arith.constant dense<0.000000e+00> : vector<18x34xf32>
    %20 = tpu.matmul %3, %19, %cst_13 {dimension_numbers = #tpu.dot_dimension_numbers<[1], [0], [0], [1], [0, 0, 1, 1], [], []>} : vector<18x16xf32>, vector<16x34xf32>, vector<18x34xf32> -> vector<18x34xf32>
    %c2 = arith.constant 2 : index
    %c0_14 = arith.constant 0 : index
    %c0_15 = arith.constant 0 : index
    %21 = vector.load %arg10[%c2, %c0_14, %c0_15] : memref<4x18x34xf32, #tpu.memory_space<vmem>>, vector<1x18x34xf32>
    %22 = vector.shape_cast %21 : vector<1x18x34xf32> to vector<18x34xf32>
    %23 = vector.shape_cast %20 : vector<18x34xf32> to vector<1x18x34xf32>
    tpu.vector_store %arg10[%c2, %c0_14, %c0_15], %23 {strides = array<i32>} : memref<4x18x34xf32, #tpu.memory_space<vmem>>, vector<1x18x34xf32>,
    %24 = vector.extract_strided_slice %8 {offsets = [48, 0], sizes = [16, 34], strides = [1, 1]} : vector<64x34xf32> to vector<16x34xf32>
    %cst_16 = arith.constant dense<0.000000e+00> : vector<18x34xf32>
    %25 = tpu.matmul %3, %24, %cst_16 {dimension_numbers = #tpu.dot_dimension_numbers<[1], [0], [0], [1], [0, 0, 1, 1], [], []>} : vector<18x16xf32>, vector<16x34xf32>, vector<18x34xf32> -> vector<18x34xf32>
    %c3 = arith.constant 3 : index
    %c0_17 = arith.constant 0 : index
    %c0_18 = arith.constant 0 : index
    %26 = vector.load %arg10[%c3, %c0_17, %c0_18] : memref<4x18x34xf32, #tpu.memory_space<vmem>>, vector<1x18x34xf32>
    %27 = vector.shape_cast %26 : vector<1x18x34xf32> to vector<18x34xf32>
    %28 = vector.shape_cast %25 : vector<18x34xf32> to vector<1x18x34xf32>
    tpu.vector_store %arg10[%c3, %c0_17, %c0_18], %28 {strides = array<i32>} : memref<4x18x34xf32, #tpu.memory_space<vmem>>, vector<1x18x34xf32>,
    %c0_19 = arith.constant 0 : index
    %c0_20 = arith.constant 0 : index
    %c0_21 = arith.constant 0 : index
    %29 = vector.load %arg10[%c0_19, %c0_20, %c0_21] : memref<4x18x34xf32, #tpu.memory_space<vmem>>, vector<4x16x32xf32>
    %30 = vector.shape_cast %29 : vector<4x16x32xf32> to vector<4x512xf32>
    %c0_22 = arith.constant 0 : index
    %c0_23 = arith.constant 0 : index
    %31 = vector.load %arg11[%c0_22, %c0_23] : memref<37x512xf32, #tpu.memory_space<vmem>>, vector<4x512xf32>
    tpu.vector_store %arg11[%c0_22, %c0_23], %30 {strides = array<i32>} : memref<37x512xf32, #tpu.memory_space<vmem>>, vector<4x512xf32>,
    %c0_24 = arith.constant 0 : index
    %c0_25 = arith.constant 0 : index
    %c1_26 = arith.constant 1 : index
    %32 = vector.load %arg10[%c0_24, %c0_25, %c1_26] : memref<4x18x34xf32, #tpu.memory_space<vmem>>, vector<4x16x32xf32>
    %33 = vector.shape_cast %32 : vector<4x16x32xf32> to vector<4x512xf32>
    %c4 = arith.constant 4 : index
    %c0_27 = arith.constant 0 : index
    %34 = vector.load %arg11[%c4, %c0_27] : memref<37x512xf32, #tpu.memory_space<vmem>>, vector<4x512xf32>
    tpu.vector_store %arg11[%c4, %c0_27], %33 {strides = array<i32>} : memref<37x512xf32, #tpu.memory_space<vmem>>, vector<4x512xf32>,
    %c0_28 = arith.constant 0 : index
    %c0_29 = arith.constant 0 : index
    %c2_30 = arith.constant 2 : index
    %35 = vector.load %arg10[%c0_28, %c0_29, %c2_30] : memref<4x18x34xf32, #tpu.memory_space<vmem>>, vector<4x16x32xf32>
    %36 = vector.shape_cast %35 : vector<4x16x32xf32> to vector<4x512xf32>
    %c8 = arith.constant 8 : index
    %c0_31 = arith.constant 0 : index
    %37 = vector.load %arg11[%c8, %c0_31] : memref<37x512xf32, #tpu.memory_space<vmem>>, vector<4x512xf32>
    tpu.vector_store %arg11[%c8, %c0_31], %36 {strides = array<i32>} : memref<37x512xf32, #tpu.memory_space<vmem>>, vector<4x512xf32>,
    %c0_32 = arith.constant 0 : index
    %c1_33 = arith.constant 1 : index
    %c0_34 = arith.constant 0 : index
    %38 = vector.load %arg10[%c0_32, %c1_33, %c0_34] : memref<4x18x34xf32, #tpu.memory_space<vmem>>, vector<4x16x32xf32>
    %39 = vector.shape_cast %38 : vector<4x16x32xf32> to vector<4x512xf32>
    %c12 = arith.constant 12 : index
    %c0_35 = arith.constant 0 : index
    %40 = vector.load %arg11[%c12, %c0_35] : memref<37x512xf32, #tpu.memory_space<vmem>>, vector<4x512xf32>
    tpu.vector_store %arg11[%c12, %c0_35], %39 {strides = array<i32>} : memref<37x512xf32, #tpu.memory_space<vmem>>, vector<4x512xf32>,
    %c0_36 = arith.constant 0 : index
    %c1_37 = arith.constant 1 : index
    %c1_38 = arith.constant 1 : index
    %41 = vector.load %arg10[%c0_36, %c1_37, %c1_38] : memref<4x18x34xf32, #tpu.memory_space<vmem>>, vector<4x16x32xf32>
    %42 = vector.shape_cast %41 : vector<4x16x32xf32> to vector<4x512xf32>
    %c16 = arith.constant 16 : index
    %c0_39 = arith.constant 0 : index
    %43 = vector.load %arg11[%c16, %c0_39] : memref<37x512xf32, #tpu.memory_space<vmem>>, vector<4x512xf32>
    tpu.vector_store %arg11[%c16, %c0_39], %42 {strides = array<i32>} : memref<37x512xf32, #tpu.memory_space<vmem>>, vector<4x512xf32>,
    %c0_40 = arith.constant 0 : index
    %c1_41 = arith.constant 1 : index
    %c2_42 = arith.constant 2 : index
    %44 = vector.load %arg10[%c0_40, %c1_41, %c2_42] : memref<4x18x34xf32, #tpu.memory_space<vmem>>, vector<4x16x32xf32>
    %45 = vector.shape_cast %44 : vector<4x16x32xf32> to vector<4x512xf32>
    %c20 = arith.constant 20 : index
    %c0_43 = arith.constant 0 : index
    %46 = vector.load %arg11[%c20, %c0_43] : memref<37x512xf32, #tpu.memory_space<vmem>>, vector<4x512xf32>
    tpu.vector_store %arg11[%c20, %c0_43], %45 {strides = array<i32>} : memref<37x512xf32, #tpu.memory_space<vmem>>, vector<4x512xf32>,
    %c0_44 = arith.constant 0 : index
    %c2_45 = arith.constant 2 : index
    %c0_46 = arith.constant 0 : index
    %47 = vector.load %arg10[%c0_44, %c2_45, %c0_46] : memref<4x18x34xf32, #tpu.memory_space<vmem>>, vector<4x16x32xf32>
    %48 = vector.shape_cast %47 : vector<4x16x32xf32> to vector<4x512xf32>
    %c24 = arith.constant 24 : index
    %c0_47 = arith.constant 0 : index
    %49 = vector.load %arg11[%c24, %c0_47] : memref<37x512xf32, #tpu.memory_space<vmem>>, vector<4x512xf32>
    tpu.vector_store %arg11[%c24, %c0_47], %48 {strides = array<i32>} : memref<37x512xf32, #tpu.memory_space<vmem>>, vector<4x512xf32>,
    %c0_48 = arith.constant 0 : index
    %c2_49 = arith.constant 2 : index
    %c1_50 = arith.constant 1 : index
    %50 = vector.load %arg10[%c0_48, %c2_49, %c1_50] : memref<4x18x34xf32, #tpu.memory_space<vmem>>, vector<4x16x32xf32>
    %51 = vector.shape_cast %50 : vector<4x16x32xf32> to vector<4x512xf32>
    %c28 = arith.constant 28 : index
    %c0_51 = arith.constant 0 : index
    %52 = vector.load %arg11[%c28, %c0_51] : memref<37x512xf32, #tpu.memory_space<vmem>>, vector<4x512xf32>
    tpu.vector_store %arg11[%c28, %c0_51], %51 {strides = array<i32>} : memref<37x512xf32, #tpu.memory_space<vmem>>, vector<4x512xf32>,
    %c0_52 = arith.constant 0 : index
    %c2_53 = arith.constant 2 : index
    %c2_54 = arith.constant 2 : index
    %53 = vector.load %arg10[%c0_52, %c2_53, %c2_54] : memref<4x18x34xf32, #tpu.memory_space<vmem>>, vector<4x16x32xf32>
    %54 = vector.shape_cast %53 : vector<4x16x32xf32> to vector<4x512xf32>
    %c32 = arith.constant 32 : index
    %c0_55 = arith.constant 0 : index
    %55 = vector.load %arg11[%c32, %c0_55] : memref<37x512xf32, #tpu.memory_space<vmem>>, vector<4x512xf32>
    tpu.vector_store %arg11[%c32, %c0_55], %54 {strides = array<i32>} : memref<37x512xf32, #tpu.memory_space<vmem>>, vector<4x512xf32>,
    %cst_56 = arith.constant 1.000000e+00 : f32
    %56 = vector.broadcast %cst_56 : f32 to vector<1x512xf32>
    %c36 = arith.constant 36 : index
    %c0_57 = arith.constant 0 : index
    %57 = vector.load %arg11[%c36, %c0_57] : memref<37x512xf32, #tpu.memory_space<vmem>>, vector<1x512xf32>
    tpu.vector_store %arg11[%c36, %c0_57], %56 {strides = array<i32>} : memref<37x512xf32, #tpu.memory_space<vmem>>, vector<1x512xf32>,
    %c0_58 = arith.constant 0 : index
    %c0_59 = arith.constant 0 : index
    %58 = vector.load %arg5[%c0_58, %c0_59] : memref<8x37xf32, #tpu.memory_space<vmem>>, vector<8x37xf32>
    %c0_60 = arith.constant 0 : index
    %c0_61 = arith.constant 0 : index
    %59 = vector.load %arg11[%c0_60, %c0_61] : memref<37x512xf32, #tpu.memory_space<vmem>>, vector<37x512xf32>
    %cst_62 = arith.constant dense<0.000000e+00> : vector<8x512xf32>
    %60 = tpu.matmul %58, %59, %cst_62 {dimension_numbers = #tpu.dot_dimension_numbers<[1], [0], [0], [1], [0, 0, 1, 1], [], []>} : vector<8x37xf32>, vector<37x512xf32>, vector<8x512xf32> -> vector<8x512xf32>
    %c0_63 = arith.constant 0 : index
    %61 = memref.load %arg8[%c0_63] : memref<1xf32, #tpu.memory_space<smem>>
    %cst_64 = arith.constant 0.000000e+00 : f32
    %62 = vector.broadcast %cst_64 : f32 to vector<8x512xf32>
    %63 = arith.cmpf ogt, %60, %62 : vector<8x512xf32>
    %64 = vector.broadcast %61 : f32 to vector<8x512xf32>
    %65 = arith.mulf %64, %60 : vector<8x512xf32>
    %66 = arith.select %63, %60, %65 : vector<8x512xi1>, vector<8x512xf32>
    %c0_65 = arith.constant 0 : index
    %c0_66 = arith.constant 0 : index
    %67 = vector.load %arg6[%c0_65, %c0_66] : memref<8x8xf32, #tpu.memory_space<vmem>>, vector<8x8xf32>
    %cst_67 = arith.constant dense<0.000000e+00> : vector<8x512xf32>
    %68 = tpu.matmul %67, %66, %cst_67 {dimension_numbers = #tpu.dot_dimension_numbers<[1], [0], [0], [1], [0, 0, 1, 1], [], []>} : vector<8x8xf32>, vector<8x512xf32>, vector<8x512xf32> -> vector<8x512xf32>
    %c0_68 = arith.constant 0 : index
    %c1_69 = arith.constant 1 : index
    %c1_70 = arith.constant 1 : index
    %69 = vector.load %arg10[%c0_68, %c1_69, %c1_70] : memref<4x18x34xf32, #tpu.memory_space<vmem>>, vector<4x16x32xf32>
    %70 = vector.shape_cast %69 : vector<4x16x32xf32> to vector<4x512xf32>
    %c0_71 = arith.constant 0 : index
    %c0_72 = arith.constant 0 : index
    %71 = vector.load %arg7[%c0_71, %c0_72] : memref<8x4xf32, #tpu.memory_space<vmem>>, vector<8x4xf32>
    %cst_73 = arith.constant dense<0.000000e+00> : vector<8x512xf32>
    %72 = tpu.matmul %71, %70, %cst_73 {dimension_numbers = #tpu.dot_dimension_numbers<[1], [0], [0], [1], [0, 0, 1, 1], [], []>} : vector<8x4xf32>, vector<4x512xf32>, vector<8x512xf32> -> vector<8x512xf32>
    %73 = arith.addf %68, %72 : vector<8x512xf32>
    %c0_74 = arith.constant 0 : index
    %c0_75 = arith.constant 0 : index
    %c0_76 = arith.constant 0 : index
    %74 = vector.load %arg9[%c0_74, %c0_75, %c0_76] : memref<1x8x512xf32, #tpu.memory_space<vmem>>, vector<1x8x512xf32>
    %75 = vector.shape_cast %74 : vector<1x8x512xf32> to vector<8x512xf32>
    %76 = vector.shape_cast %73 : vector<8x512xf32> to vector<1x8x512xf32>
    tpu.vector_store %arg9[%c0_74, %c0_75, %c0_76], %76 {strides = array<i32>} : memref<1x8x512xf32, #tpu.memory_space<vmem>>, vector<1x8x512xf32>,
    return
  }
  func.func @transform_0(%arg0: i32, %arg1: i32) -> (i32, i32, i32, i32) {
    %c0_i32 = arith.constant 0 : i32
    %c0_i32_0 = arith.constant 0 : i32
    %c0_i32_1 = arith.constant 0 : i32
    %c0_i32_2 = arith.constant 0 : i32
    return %arg0, %c0_i32, %c0_i32_0, %c0_i32_1 : i32, i32, i32, i32
  }
  func.func @transform_1(%arg0: i32, %arg1: i32) -> (i32, i32) {
    %c0_i32 = arith.constant 0 : i32
    %c0_i32_0 = arith.constant 0 : i32
    %c0_i32_1 = arith.constant 0 : i32
    return %c0_i32, %c0_i32_0 : i32, i32
  }
  func.func @transform_2(%arg0: i32, %arg1: i32) -> (i32, i32) {
    %c0_i32 = arith.constant 0 : i32
    %c0_i32_0 = arith.constant 0 : i32
    %c0_i32_1 = arith.constant 0 : i32
    return %c0_i32, %c0_i32_0 : i32, i32
  }
  func.func @transform_3(%arg0: i32, %arg1: i32) -> (i32, i32) {
    %c0_i32 = arith.constant 0 : i32
    %c0_i32_0 = arith.constant 0 : i32
    %c0_i32_1 = arith.constant 0 : i32
    return %c0_i32, %c0_i32_0 : i32, i32
  }
  func.func @transform_4(%arg0: i32, %arg1: i32) -> (i32, i32) {
    %c0_i32 = arith.constant 0 : i32
    %c0_i32_0 = arith.constant 0 : i32
    %c0_i32_1 = arith.constant 0 : i32
    return %c0_i32, %c0_i32_0 : i32, i32
  }
  func.func @transform_5(%arg0: i32, %arg1: i32) -> (i32, i32) {
    %c0_i32 = arith.constant 0 : i32
    %c0_i32_0 = arith.constant 0 : i32
    %c0_i32_1 = arith.constant 0 : i32
    return %c0_i32, %c0_i32_0 : i32, i32
  }
  func.func @transform_6(%arg0: i32, %arg1: i32) -> i32 {
    %c0_i32 = arith.constant 0 : i32
    %c0_i32_0 = arith.constant 0 : i32
    return %c0_i32 : i32
  }
  func.func @transform_7(%arg0: i32, %arg1: i32) -> (i32, i32, i32) {
    %c0_i32 = arith.constant 0 : i32
    %c0_i32_0 = arith.constant 0 : i32
    return %arg0, %c0_i32, %arg1 : i32, i32, i32
  }
}

</mosaic_0001>

<bundles_post_ra>
// kernel: upblock_forward.1
= control target key start
LH: loop header
LB: loop body
LE: loop exit
PB: predicated region body
PF: predicated region fallthrough
CT: control target
= control target key end

     0   :  { %s4082_s26 = smov 0   ;;  %s4084_s27 = smov 0   ;;  %s5652_s0 = inlined_call_operand.vmem [shape: f32[2,4,16,16], index: 0, kind: input, shape index: {}]   ;;  %s5653_s1 = inlined_call_operand.vmem [shape: f32[34,16], index: 1, kind: input, shape index: {}]   ;;  %s5654_s2 = inlined_call_operand.vmem [shape: f32[16,34], index: 2, kind: input, shape index: {}]   ;;  %s5655_s3 = inlined_call_operand.vmem [shape: f32[8,37], index: 3, kind: input, shape index: {}]   ;;  %s5656_s4 = inlined_call_operand.vmem [shape: f32[8,8], index: 4, kind: input, shape index: {}]   ;;  %s5657_s5 = inlined_call_operand.vmem [shape: f32[8,4], index: 5, kind: input, shape index: {}]   ;;  %s5658_s6 = inlined_call_operand.<no memory space> [shape: f32[1], index: 6, kind: input, shape index: {}]   ;;  %s5659_s7 = inlined_call_operand.vmem [shape: f32[2,8,1024], index: 7, kind: output, shape index: {}]  }
   0x1   :  { %12 = sst [smem:[#allocation4]] %s5658_s6  ;;  %s4086_s28 = smov 0  }
   0x2   :  { %s4088_s29 = smov 0   ;;  %s4090_s30 = smov 0  }
   0x3 LB: > { %s27_s6 = sadd.s32 1, %s4018_s28  ;;  %s30_s8 = sadd.s32 1, %s4022_s29  ;;  %s4026_s30 = sphi %s4090_s30, %s18_s30   ;;  %s4022_s29 = sphi %s4088_s29, %s5718_s29   ;;  %s4018_s28 = sphi %s4086_s28, %s5717_s28   ;;  %s4014_s27 = sphi %s4084_s27, %s5716_s27   ;;  %s4010_s26 = sphi %s4082_s26, %s5715_s26  }
   0x4   : > { %p28_p0 = scmp.ge.s32.totalorder %s27_s6, 2  ;;  %p3747_p1 = scmp.ge.s32.totalorder %s4026_s30, 1 }
   0x5   : > { %p252_p2 = scmp.lt.s32.totalorder %s4026_s30, 5 }
   0x6   : > { %s5720_s6 = smov (%p28_p0, %s27_s6), 0  ;;  %s5722_s8 = smov (!%p28_p0, %s30_s8), %s4022_s29 }
   0x7   : > { %p253_p3 = pnand %p3747_p1, %p252_p2  ;;  %p32_p4 = scmp.ge.s32.totalorder %s5722_s8, 2 }
   0x9   : > { %s5724_s8 = smov (%p32_p4, %s5722_s8), 0  ;;  %256 = sbr.rel (%p253_p3) target bundleno = 1346 (0x542), region = 48 }
  0x10   : > { %v316_v0 = vld [vmem:[%s5654_s2] sm:$0xff]  ;;  %v317_v1 = vld [vmem:[%s5654_s2 + $0x8] sm:$0xff]  ;;  %p288_p5 = scmp.lt.s32.totalorder %s4014_s27, 1  ;;  %vm318_vm0 = vcmask 130048   ;;  %v4028_v11 = vmov 0.0|0.0   ;;  %vm4029_vm1 = vmmov 0   ;;  %v5660_v55 = vlaneseq }
  0x11   : > { %v3889_v2 = vpack.c.bf16 %v317_v1, %v316_v0  ;;  %v5663_v12 = vmov 0.0   ;;  %s3753_s17 = sshll.u32 %s4010_s26, 4  ;;  %vm537_vm2 = vcmask 277504   ;;  %vm540_vm3 = vcmask 271360   ;;  %s4031_s21 = smov 127  }
  0x12   : > { %s5726_s27 = smov (!%p288_p5, %s4014_s27), 1  ;;  %s304_s20 = scalar_lea.vmem %s5653_s1, %s3753_s17  ;;  %v4033_v53 = vmov 1983009808   ;;  %v4225_v63 = vshrl.u32 %v5660_v55, 7  ;;  %vm986_vm4 = vcmask 261120   ;;  %vm988_vm5 = vcmask 523264  }
  0x13   : > { %3890 = vmatprep.subr.bf16.mxu0 %v3889_v2  ;;  %3921 = vmatprep.subr.bf16.mxu1 %v3889_v2  ;;  %s3790_s13 = sshll.u32 %s5726_s27, 6  ;;  %v305_v19 = vld [vmem:[%s304_s20] sm:$0xff]  ;;  %v306_v24 = vld [vmem:[%s304_s20 + $0x8] sm:$0xff]  ;;  %v307_v27 = vld [vmem:[%s304_s20 + $0x10] sm:$0x3]  ;;  %s4032_s22 = smov 126   ;;  %v805_v54 = vunpack.c.l.s4 %v4033_v53 }
  0x14   : > { %3892 = vmatpush3.bf16.msra.mxu0 %v3889_v2  ;;  %3922 = vmatpush3.bf16.msra.mxu1 %v3889_v2  ;;  %s292_s16 = scalar_lea.vmem %s5652_s0, %s3790_s13  ;;  %s4035_s23 = smov 64   ;;  %vm990_vm6 = vcmask 785408   ;;  %vm2941_vm8 = vcmask 1044480   ;;  %vm2937_vm9 = vcmask 302080   ;;  %vm3352_vm10 = vcmask 1043456  }
  0x15   : > { %v308_v3 = vld [vmem:[%s292_s16] sm:$0xff]  ;;  %v309_v4 = vld [vmem:[%s292_s16 + $0x8] sm:$0xff]  ;;  %v310_v5 = vld [vmem:[%s292_s16 + $0x10] sm:$0xff]  ;;  %3893 = vmatprep.subr.bf16.mxu1 %v4028_v11  ;;  %3899 = vmatprep.subr.bf16.mxu0 %v4028_v11  ;;  %v806_v62 = vunpack.c.0.s8 %v805_v54  ;;  %s4036_s24 = smov 32   ;;  %s4037_s25 = smov 96   ;;  %vm3348_vm11 = vcmask 31744  }
  0x16   : > { %3825 = vmatprep.mubr.msk.f32.mxu0 %vm318_vm0, %v308_v3  ;;  %v314_v6 = vld [vmem:[%s292_s16 + $0x30] sm:$0xff]  ;;  %v315_v7 = vld [vmem:[%s292_s16 + $0x38] sm:$0xff]  ;;  %v312_v9 = vld [vmem:[%s292_s16 + $0x20] sm:$0xff]  ;;  %s3096_s13 = sld [smem:[#allocation4]]  ;;  %vm3507_vm14 = vcmask 64512   ;;  %s3751_s17 = sshll.u32 %s5726_s27, 3 }
  0x17   : > { %3826 = vmatmul.mubr.msk.f32.vlgmr.msra.gmra.mrb[0].mxu0 %vm318_vm0, %v309_v4  ;;  %v311_v8 = vld [vmem:[%s292_s16 + $0x18] sm:$0xff]  ;;  %3834 = vmatprep.mubr.msk.f32.mxu1 %vm318_vm0, %v314_v6  ;;  %v313_v10 = vld [vmem:[%s292_s16 + $0x28] sm:$0xff]  ;;  %v4234_v4 = vsub.s32 %v806_v62, %v4225_v63  ;;  %s3750_s16 = sshll.u32 %s4010_s26, 2 }
  0x18   : > { %3828 = vmatprep.mubr.msk.f32.mxu0 %vm318_vm0, %v310_v5  ;;  %3835 = vmatmul.mubr.msk.f32.vlgmr.msra.gmra.mrb[0].mxu1 %vm318_vm0, %v315_v7  ;;  %p296_p6 = scmp.lt.s32.totalorder %s3750_s16, 7 }
  0x19   : > { %3841 = vmatprep.mubr.msk.f32.mxu1 %vm4029_vm1, %v5663_v12 }
  0x1a   : > { %s5728_s16 = smov (!%p296_p6, %s3750_s16), 7 }
  0x1b   : > { %3829 = vmatmul.mubr.msk.f32.gmra.mrb[2].mxu0 %vm318_vm0, %v311_v8  ;;  %s299_s18 = sadd.s32 %s3751_s17, %s5728_s16 }
  0x1c   : > { %3831 = vmatprep.mubr.msk.f32.mxu0 %vm318_vm0, %v312_v9  ;;  %s3752_s19 = sshll.u32 %s299_s18, 3 }
  0x1f   : > { %3832 = vmatmul.mubr.msk.f32.gmra.mrb[4].mxu0 %vm318_vm0, %v313_v10 }
  0x20   : > { %3867 = vmatprep.mubr.msk.f32.mxu0 %vm4029_vm1, %v5663_v12 }
  0xea   : > { %v3827_v13 = vpop.f32.mrb[0].mxu0 }
  0xeb   : > { %v409_v14 = vpop.f32.mrb[1].mxu0  ;;  %v3836_v16 = vpop.f32.mrb[0].mxu1 }
  0xec   : > { %v3894_v15 = vpack.c.bf16 %v3827_v13, %v409_v14  ;;  %v439_v17 = vpop.f32.mrb[1].mxu1 }
  0xed   : > { %v3903_v20 = vpack.c.bf16 %v3836_v16, %v439_v17 }
  0xee   : > { %v3830_v18 = vpop.f32.mrb[2].mxu0  ;;  %3895 = vmatpush3.bf16.msra.mxu1 %v3894_v15 }
  0xef   : > { %v419_v21 = vpop.f32.mrb[3].mxu0  ;;  %3896 = vmatprep.subr.bf16.mxu1 %v4028_v11 }
  0xf0   : > { %v3897_v22 = vpack.c.bf16 %v3830_v18, %v419_v21 }
  0xf1   : > { %3842 = vmatmul.mubr.msk.f32.vlgmr.msra.gmra.mrb[2].mxu1 %vm318_vm0, %v305_v19 }
  0xf2   : > { %v3833_v23 = vpop.f32.mrb[4].mxu0  ;;  %3898 = vmatpush3.bf16.msra.mxu1 %v3897_v22  ;;  %3844 = vmatprep.mubr.msk.f32.mxu1 %vm4029_vm1, %v5663_v12 }
  0xf3   : > { %v429_v25 = vpop.f32.mrb[5].mxu0  ;;  %3902 = vmatprep.subr.bf16.mxu1 %v4028_v11 }
  0xf4   : > { %v3900_v26 = vpack.c.bf16 %v3833_v23, %v429_v25 }
  0xf5   : > { %3845 = vmatmul.mubr.msk.f32.gmra.mrb[4].mxu1 %vm318_vm0, %v306_v24 }
  0xf6   : > { %3901 = vmatpush3.bf16.msra.mxu0 %v3900_v26  ;;  %3847 = vmatprep.mubr.msk.f32.mxu1 %vm4029_vm1, %v5663_v12 }
  0xf9   : > { %3848 = vmatmul.mubr.msk.f32.gmra.mrb[6].mxu1 %vm318_vm0, %v307_v27  ;;  %3868 = vmatmul.mubr.msk.f32.vlgmr.msra.gmra.mrb[6].mxu0 %vm318_vm0, %v305_v19 }
  0xfa   : > { %3854 = vmatprep.mubr.msk.f32.mxu1 %vm4029_vm1, %v5663_v12  ;;  %3870 = vmatprep.mubr.msk.f32.mxu0 %vm4029_vm1, %v5663_v12 }
  0xfd   : > { %3855 = vmatmul.mubr.msk.f32.vlgmr.msra.gmra.mrb[8].mxu1 %vm318_vm0, %v305_v19  ;;  %3871 = vmatmul.mubr.msk.f32.gmra.mrb[8].mxu0 %vm318_vm0, %v306_v24 }
  0xfe   : > { %3857 = vmatprep.mubr.msk.f32.mxu1 %vm4029_vm1, %v5663_v12  ;;  %3873 = vmatprep.mubr.msk.f32.mxu0 %vm4029_vm1, %v5663_v12 }
  0xff   : > { %3904 = vmatpush3.bf16.msra.mxu1 %v3903_v20 }
 0x101   : > { %3858 = vmatmul.mubr.msk.f32.gmra.mrb[10].mxu1 %vm318_vm0, %v306_v24  ;;  %3874 = vmatmul.mubr.msk.f32.gmra.mrb[10].mxu0 %vm318_vm0, %v307_v27 }
 0x102   : > { %3860 = vmatprep.mubr.msk.f32.mxu1 %vm4029_vm1, %v5663_v12  ;;  %3018 = vmatprep.mubr.f32.mxu0 %v5663_v12 }
 0x105   : > { %3861 = vmatmul.mubr.msk.f32.gmra.mrb[12].mxu1 %vm318_vm0, %v307_v27 }
 0x106   : > { %3880 = vmatprep.mubr.msk.f32.mxu1 %vm4029_vm1, %v5663_v12 }
 0x109   : > { %3881 = vmatmul.mubr.msk.f32.vlgmr.msra.gmra.mrb[14].mxu1 %vm318_vm0, %v305_v19 }
 0x10a   : > { %3883 = vmatprep.mubr.msk.f32.mxu1 %vm4029_vm1, %v5663_v12 }
 0x10d   : > { %3884 = vmatmul.mubr.msk.f32.gmra.mrb[16].mxu1 %vm318_vm0, %v306_v24 }
 0x10e   : > { %3886 = vmatprep.mubr.msk.f32.mxu1 %vm4029_vm1, %v5663_v12 }
 0x111   : > { %3887 = vmatmul.mubr.msk.f32.gmra.mrb[18].mxu1 %vm318_vm0, %v307_v27 }
 0x112   : > { %3089 = vmatprep.mubr.f32.mxu1 %v5663_v12 }
 0x1c4   : > { %v523_v28 = vpop.f32.mrb[2].mxu1 }
 0x1c5   : > { %538 = vst.msk [vmem:[#allocation2] sm:$0xff] %vm537_vm2, %v523_v28  ;;  %v3843_v29 = vpop.f32.mrb[3].mxu1 }
 0x1c8   : > { %v528_v30 = vpop.f32.mrb[4].mxu1 }
 0x1c9   : > { %539 = vst.msk [vmem:[#allocation2 + $0x8] sm:$0xff] %vm537_vm2, %v528_v30  ;;  %v3846_v31 = vpop.f32.mrb[5].mxu1 }
 0x1cc   : > { %v692_v32 = vpop.f32.mrb[6].mxu0  ;;  %v4178_v33 = vld [vmem:[#allocation2] sm:$0xff]  ;;  %v533_v34 = vpop.f32.mrb[6].mxu1 }
 0x1cd   : > { %707 = vst.msk [vmem:[#allocation2 + $0x30] sm:$0xff] %vm537_vm2, %v692_v32  ;;  %1021 = vrot.lane.b32.xlu0 %v4178_v33, %s4031_s21  ;;  %v3849_v35 = vpop.f32.mrb[7].mxu1  ;;  %v3869_v36 = vpop.f32.mrb[7].mxu0 }
 0x1ce   : > { %541 = vst.msk [vmem:[#allocation2 + $0x10] sm:$0x3] %vm540_vm3, %v533_v34 }
 0x1d0   : > { %v608_v37 = vpop.f32.mrb[8].mxu1  ;;  %v697_v38 = vpop.f32.mrb[8].mxu0  ;;  %v4188_v43 = vld [vmem:[#allocation2 + $0x8] sm:$0xff] }
 0x1d1   : > { %623 = vst.msk [vmem:[#allocation2 + $0x18] sm:$0xff] %vm537_vm2, %v608_v37  ;;  %708 = vst.msk [vmem:[#allocation2 + $0x38] sm:$0xff] %vm537_vm2, %v697_v38  ;;  %1273 = vrot.lane.b32.xlu0 %v4178_v33, %s4032_s22  ;;  %v3856_v39 = vpop.f32.mrb[9].mxu1  ;;  %v3872_v40 = vpop.f32.mrb[9].mxu0  ;;  %v4202_v49 = vld [vmem:[#allocation2 + $0x1] sm:$0xff] }
 0x1d2   : > { %v4211_v57 = vld [vmem:[#allocation2 + $0x2] sm:$0xff] }
 0x1d4   : > { %v613_v41 = vpop.f32.mrb[10].mxu1  ;;  %v702_v42 = vpop.f32.mrb[10].mxu0  ;;  %v4190_v44 = vld [vmem:[#allocation2 + $0x30] sm:$0xff] }
 0x1d5   : > { %624 = vst.msk [vmem:[#allocation2 + $0x20] sm:$0xff] %vm537_vm2, %v613_v41  ;;  %1023 = vrot.lane.b32.xlu0 %v4188_v43, %s4031_s21  ;;  %1029 = vrot.lane.b32.xlu1 %v4190_v44, %s4031_s21  ;;  %v3859_v45 = vpop.f32.mrb[11].mxu1  ;;  %v802_v46 = vcombine.low %v4178_v33, %v4190_v44  ;;  %v3875_v47 = vpop.f32.mrb[11].mxu0  ;;  %v803_v48 = vcombine.high %v4178_v33, %v4190_v44  ;;  %v4220_v60 = vld [vmem:[#allocation2 + $0x9] sm:$0xff] }
 0x1d6   : > { %709 = vst.msk [vmem:[#allocation2 + $0x40] sm:$0x3] %vm540_vm3, %v702_v42 }
 0x1d7   : > { %v4253_v15 = vrot.slane %v802_v46, %v4234_v4  ;;  %v4256_v16 = vrot.slane %v803_v48, %v4234_v4 }
 0x1d8   : > { %v4204_v50 = vld [vmem:[#allocation2 + $0x18] sm:$0xff]  ;;  %v618_v51 = vpop.f32.mrb[12].mxu1 }
 0x1d9   : > { %1973 = vrot.lane.b32.xlu0 %v4202_v49, %s4032_s22  ;;  %1277 = vrot.lane.b32.xlu1 %v4204_v50, %s4032_s22  ;;  %625 = vst.msk [vmem:[#allocation2 + $0x28] sm:$0x3] %vm540_vm3, %v618_v51  ;;  %v3862_v52 = vpop.f32.mrb[13].mxu1  ;;  %v4238_v8 = vld [vmem:[#allocation2 + $0x31] sm:$0xff] }
 0x1da   : > { %v4244_v9 = vld [vmem:[#allocation2 + $0x38] sm:$0xff]  ;;  %v1506_v19 = vcombine.high %v4202_v49, %v4238_v8  ;;  %v1505_v20 = vcombine.low %v4202_v49, %v4238_v8 }
 0x1db   : > { %v4246_v10 = vld [vmem:[#allocation2 + $0x32] sm:$0xff]  ;;  %v871_v24 = vcombine.high %v4188_v43, %v4244_v9  ;;  %v870_v37 = vcombine.low %v4188_v43, %v4244_v9 }
 0x1dc   : > { %v776_v56 = vpop.f32.mrb[14].mxu1  ;;  %v4213_v58 = vld [vmem:[#allocation2 + $0x20] sm:$0xff]  ;;  %v2218_v25 = vcombine.high %v4211_v57, %v4246_v10  ;;  %v2217_v26 = vcombine.low %v4211_v57, %v4246_v10  ;;  %v4297_v34 = vrot.slane %v1506_v19, %v4234_v4  ;;  %v4300_v35 = vrot.slane %v1505_v20, %v4234_v4 }
 0x1dd   : > { %791 = vst.msk [vmem:[#allocation2 + $0x48] sm:$0xff] %vm537_vm2, %v776_v56  ;;  %2433 = vrot.lane.b32.xlu0 %v4211_v57, %s4031_s21  ;;  %1027 = vrot.lane.b32.xlu1 %v4213_v58, %s4031_s21  ;;  %v3882_v59 = vpop.f32.mrb[15].mxu1  ;;  %v4222_v61 = vld [vmem:[#allocation2 + $0x39] sm:$0xff]  ;;  %v4312_v40 = vrot.slane %v871_v24, %v4234_v4  ;;  %v4341_v52 = vrot.slane %v870_v37, %v4234_v4 }
 0x1de   : > { %v1574_v0 = vcombine.high %v4220_v60, %v4222_v61  ;;  %v1959_v2 = vld [vmem:[#allocation2 + $0x19] sm:$0xff]  ;;  %v4327_v46 = vrot.slane %v2218_v25, %v4234_v4  ;;  %v4338_v51 = vrot.slane %v2217_v26, %v4234_v4 }
 0x1df   : > { %v2419_v6 = vld [vmem:[#allocation2 + $0x1a] sm:$0xff] }
 0x1e0   : > { %v781_v1 = vpop.f32.mrb[16].mxu1  ;;  %v4358_v59 = vld [vmem:[#allocation2 + $0x3a] sm:$0xff]  ;;  %v2420_v24 = vld [vmem:[#allocation2 + $0x22] sm:$0xff] }
 0x1e1   : > { %792 = vst.msk [vmem:[#allocation2 + $0x50] sm:$0xff] %vm537_vm2, %v781_v1  ;;  %1275 = vrot.lane.b32.xlu0 %v4188_v43, %s4032_s22  ;;  %1977 = vrot.lane.b32.xlu1 %v1959_v2, %s4032_s22  ;;  %v3885_v3 = vpop.f32.mrb[17].mxu1 }
 0x1e2   : > { %v1960_v3 = vld [vmem:[#allocation2 + $0x21] sm:$0xff] }
 0x1e4   : > { %v786_v5 = vpop.f32.mrb[18].mxu1  ;;  %v4236_v7 = vld [vmem:[#allocation2 + $0x48] sm:$0xff] }
 0x1e5   : > { %793 = vst.msk [vmem:[#allocation2 + $0x58] sm:$0x3] %vm540_vm3, %v786_v5  ;;  %1733 = vrot.lane.b32.xlu0 %v4202_v49, %s4031_s21  ;;  %2437 = vrot.lane.b32.xlu1 %v2419_v6, %s4031_s21  ;;  %v818_v11 = vcombine.low %v4204_v50, %v4236_v7  ;;  %v3888_v13 = vpop.f32.mrb[19].mxu1  ;;  %v819_v14 = vcombine.high %v4204_v50, %v4236_v7 }
 0x1e7   : > { %v4259_v17 = vrot.slane %v818_v11, %v4234_v4  ;;  %v4262_v18 = vrot.slane %v819_v14, %v4234_v4  ;;  %v1573_v14 = vcombine.low %v4220_v60, %v4222_v61 }
 0x1e8   : > { %v4268_v21 = vld [vmem:[#allocation2 + $0x50] sm:$0xff] }
 0x1e9   : > { %v4270_v22 = vld [vmem:[#allocation2 + $0x49] sm:$0xff]  ;;  %2685 = vrot.lane.b32.xlu0 %v4211_v57, %s4032_s22  ;;  %1279 = vrot.lane.b32.xlu1 %v4213_v58, %s4032_s22  ;;  %v835_v27 = vcombine.high %v4253_v15, %v4259_v17  ;;  %v850_v28 = vcombine.low %v4256_v16, %v4262_v18  ;;  %v851_v29 = vcombine.high %v4256_v16, %v4262_v18 }
 0x1ea   : > { %v4272_v23 = vld [vmem:[#allocation2 + $0x4a] sm:$0xff]  ;;  %v834_v30 = vcombine.low %v4253_v15, %v4259_v17  ;;  %v1522_v31 = vcombine.high %v1959_v2, %v4270_v22  ;;  %v1521_v32 = vcombine.low %v1959_v2, %v4270_v22  ;;  %v887_v33 = vcombine.high %v4213_v58, %v4268_v21 }
 0x1eb   : > { %v2234_v36 = vcombine.high %v2419_v6, %v4272_v23  ;;  %v2233_v48 = vcombine.low %v2419_v6, %v4272_v23 }
 0x1ec   : > { %v4306_v38 = vrot.slane %v1522_v31, %v4234_v4  ;;  %v4309_v39 = vrot.slane %v1521_v32, %v4234_v4  ;;  %v4315_v41 = vrot.slane %v887_v33, %v4234_v4  ;;  %v4364_v5 = vld [vmem:[#allocation2 + $0x51] sm:$0xff]  ;;  %v4386_v32 = vrot.slane %v1573_v14, %v4234_v4 }
 0x1ed   : > { %1281 = vrot.lane.b32.xlu0 %v4190_v44, %s4032_s22  ;;  %1737 = vrot.lane.b32.xlu1 %v1959_v2, %s4031_s21  ;;  %v4330_v47 = vrot.slane %v2234_v36, %v4234_v4  ;;  %v886_v44 = vcombine.low %v4213_v58, %v4268_v21  ;;  %v4351_v56 = vrot.slane %v2233_v48, %v4234_v4  ;;  %v2418_v2 = vld [vmem:[#allocation2 + $0xa] sm:$0xff]  ;;  %v4370_v11 = vld [vmem:[#allocation2 + $0x52] sm:$0xff] }
 0x1ee   : > { %v1554_v42 = vcombine.high %v4297_v34, %v4306_v38  ;;  %v1538_v43 = vcombine.high %v4300_v35, %v4309_v39  ;;  %v919_v45 = vcombine.high %v4312_v40, %v4315_v41  ;;  %v1553_v49 = vcombine.low %v4297_v34, %v4306_v38 }
 0x1ef   : > { %v1537_v53 = vcombine.low %v4300_v35, %v4309_v39  ;;  %v2266_v54 = vcombine.high %v4327_v46, %v4330_v47  ;;  %v4354_v57 = vrot.slane %v886_v44, %v4234_v4  ;;  %v918_v58 = vcombine.low %v4312_v40, %v4315_v41 }
 0x1f0   : > { %v2250_v62 = vcombine.high %v4338_v51, %v4351_v56  ;;  %v2265_v13 = vcombine.low %v4327_v46, %v4330_v47  ;;  %v2286_v20 = vcombine.high %v2418_v2, %v4358_v59  ;;  %v1589_v25 = vcombine.low %v1960_v3, %v4364_v5 }
 0x1f1   : > { %1975 = vrot.lane.b32.xlu0 %v4220_v60, %s4032_s22  ;;  %2689 = vrot.lane.b32.xlu1 %v2419_v6, %s4032_s22  ;;  %v903_v1 = vcombine.high %v4341_v52, %v4354_v57  ;;  %v902_v6 = vcombine.low %v4341_v52, %v4354_v57  ;;  %v2302_v26 = vcombine.high %v2420_v24, %v4370_v11 }
 0x1f2   : > { %v2285_v31 = vcombine.low %v2418_v2, %v4358_v59  ;;  %v4389_v33 = vrot.slane %v1589_v25, %v4234_v4  ;;  %v1590_v36 = vcombine.high %v1960_v3, %v4364_v5  ;;  %v4393_v37 = vrot.slane %v2286_v20, %v4234_v4 }
 0x1f3   : > { %v4396_v48 = vrot.slane %v2302_v26, %v4234_v4  ;;  %v2301_v44 = vcombine.low %v2420_v24, %v4370_v11  ;;  %v4405_v14 = vrot.slane %v1574_v0, %v4234_v4 }
 0x1f4   : > { %v4408_v25 = vrot.slane %v1590_v36, %v4234_v4  ;;  %v1605_v20 = vcombine.low %v4386_v32, %v4389_v33  ;;  %v4415_v19 = vrot.slane %v2285_v31, %v4234_v4 }
 0x1f5   : > { %2435 = vrot.lane.b32.xlu0 %v2418_v2, %s4031_s21  ;;  %1979 = vrot.lane.b32.xlu1 %v1960_v3, %s4032_s22  ;;  %v2334_v26 = vcombine.high %v4393_v37, %v4396_v48  ;;  %v4418_v55 = vrot.slane %v2301_v44, %v4234_v4 }
 0x1f6   : > { %v1622_v0 = vcombine.high %v4405_v14, %v4408_v25  ;;  %v1621_v36 = vcombine.low %v4405_v14, %v4408_v25 }
 0x1f7   : > { %v2318_v31 = vcombine.high %v4415_v19, %v4418_v55  ;;  %v2317_v44 = vcombine.low %v4415_v19, %v4418_v55 }
 0x1f9   : > { %1735 = vrot.lane.b32.xlu0 %v4220_v60, %s4031_s21  ;;  %2439 = vrot.lane.b32.xlu1 %v2420_v24, %s4031_s21  ;;  %v2333_v60 = vcombine.low %v4393_v37, %v4396_v48 }
 0x1fd   : > { %2687 = vrot.lane.b32.xlu0 %v2418_v2, %s4032_s22  ;;  %1739 = vrot.lane.b32.xlu1 %v1960_v3, %s4031_s21 }
 0x201   : > { %1025 = vrot.lane.b32.xlu0 %v4204_v50, %s4031_s21  ;;  %2691 = vrot.lane.b32.xlu1 %v2420_v24, %s4032_s22  ;;  %v4034_v50 = vmov 1934713408   ;;  %v5679_v24 = vcombine.low %v4338_v51, %v4351_v56 }
 0x205   : > { %1033 = vrot.lane.b32.xlu1 %v4236_v7, %s4031_s21  ;;  %1031 = vrot.lane.b32.xlu0 %v4244_v9, %s4031_s21 }
 0x209   : > { %1285 = vrot.lane.b32.xlu1 %v4236_v7, %s4032_s22  ;;  %1981 = vrot.lane.b32.xlu0 %v4238_v8, %s4032_s22  ;;  %v837_v7 = vunpack.c.l.s4 %v4034_v50 }
 0x20d   : > { %1035 = vrot.lane.b32.xlu1 %v4268_v21, %s4031_s21  ;;  %2441 = vrot.lane.b32.xlu0 %v4246_v10, %s4031_s21 }
 0x211   : > { %1985 = vrot.lane.b32.xlu1 %v4270_v22, %s4032_s22  ;;  %1283 = vrot.lane.b32.xlu0 %v4244_v9, %s4032_s22 }
 0x215   : > { %2445 = vrot.lane.b32.xlu1 %v4272_v23, %s4031_s21  ;;  %1741 = vrot.lane.b32.xlu0 %v4238_v8, %s4031_s21  ;;  %v838_v8 = vunpack.c.0.s8 %v837_v7 }
 0x217   : > { %v4472_v9 = vsub.s32 %v838_v8, %v4225_v63 }
 0x219   : > { %1287 = vrot.lane.b32.xlu1 %v4268_v21, %s4032_s22  ;;  %2693 = vrot.lane.b32.xlu0 %v4246_v10, %s4032_s22  ;;  %v849_v10 = vrot.slane %v835_v27, %v4472_v9  ;;  %v4486_v21 = vrot.slane %v850_v28, %v4472_v9  ;;  %v4497_v63 = vrot.slane %v834_v30, %v4472_v9 }
 0x21a   : > { %v1568_v16 = vrot.slane %v1554_v42, %v4472_v9  ;;  %v1552_v18 = vrot.slane %v1538_v43, %v4472_v9  ;;  %v933_v28 = vrot.slane %v919_v45, %v4472_v9  ;;  %v2264_v42 = vrot.slane %v2250_v62, %v4472_v9 }
 0x21b   : > { %v867_v17 = vcombine.high %v849_v10, %v5663_v12  ;;  %v917_v43 = vrot.slane %v903_v1, %v4472_v9  ;;  %v4550_v45 = vrot.slane %v1553_v49, %v4472_v9  ;;  %v4572_v35 = vrot.slane %v918_v58, %v4472_v9 }
 0x21c   : > { %v1572_v49 = vcombine.high %v1568_v16, %v5663_v12  ;;  %v4587_v40 = vrot.slane %v902_v6, %v4472_v9  ;;  %v1570_v2 = vcombine.high %v1552_v18, %v5663_v12  ;;  %v4602_v52 = vrot.slane %v2265_v13, %v4472_v9 }
 0x21d   : > { %1745 = vrot.lane.b32.xlu1 %v4270_v22, %s4031_s21  ;;  %1983 = vrot.lane.b32.xlu0 %v4222_v61, %s4032_s22  ;;  %v865_v22 = vrot.slane %v851_v29, %v4472_v9  ;;  %v2280_v29 = vrot.slane %v2266_v54, %v4472_v9  ;;  %v4556_v54 = vrot.slane %v1537_v53, %v4472_v9 }
 0x21e   : > { %v1571_v1 = vcombine.high %v4550_v45, %v5663_v12  ;;  %v936_v53 = vcombine.high %v4572_v35, %v5663_v12  ;;  %v934_v3 = vcombine.high %v4587_v40, %v5663_v12  ;;  %v2283_v6 = vcombine.high %v4602_v52, %v5663_v12 }
 0x21f   : > { %v869_v15 = vcombine.high %v865_v22, %v5663_v12  ;;  %v1569_v34 = vcombine.high %v4556_v54, %v5663_v12  ;;  %v4617_v46 = vrot.slane %v5679_v24, %v4472_v9  ;;  %v935_v7 = vcombine.high %v917_v43, %v5663_v12 }
 0x220   : > { %v937_v8 = vcombine.high %v933_v28, %v5663_v12 }
 0x221   : > { %2697 = vrot.lane.b32.xlu1 %v4272_v23, %s4032_s22  ;;  %2443 = vrot.lane.b32.xlu0 %v4358_v59, %s4031_s21  ;;  %v866_v23 = vcombine.high %v4497_v63, %v5663_v12  ;;  %v2281_v50 = vcombine.high %v4617_v46, %v5663_v12 }
 0x225   : > { %1987 = vrot.lane.b32.xlu1 %v4364_v5, %s4032_s22  ;;  %1743 = vrot.lane.b32.xlu0 %v4222_v61, %s4031_s21  ;;  %v868_v61 = vcombine.high %v4486_v21, %v5663_v12 }
 0x229   : > { %2447 = vrot.lane.b32.xlu1 %v4370_v11, %s4031_s21  ;;  %2695 = vrot.lane.b32.xlu0 %v4358_v59, %s4032_s22 }
 0x22d   : > { %1747 = vrot.lane.b32.xlu1 %v4364_v5, %s4031_s21  ;;  %943 = vrot.lane.b32.xlu0 %v849_v10, %s4035_s23  ;;  %v5680_v10 = vcombine.high %v4386_v32, %v4389_v33 }
 0x231   : > { %2699 = vrot.lane.b32.xlu1 %v4370_v11, %s4032_s22  ;;  %951 = vrot.lane.b32.xlu0 %v868_v61, %s4036_s24  ;;  %v2284_v11 = vcombine.high %v2280_v29, %v5663_v12  ;;  %v1620_v61 = vrot.slane %v5680_v10, %v4472_v9  ;;  %s301_s22 = scalar_lea.vmem %s5659_s7, %s3752_s19 }
 0x235   : > { %955 = vrot.lane.b32.xlu1 %v865_v22, %s4035_s23  ;;  %939 = vrot.lane.b32.xlu0 %v866_v23, %s4036_s24 }
 0x239   : > { %959 = vrot.lane.b32.xlu1 %v869_v15, %s4037_s25  ;;  %947 = vrot.lane.b32.xlu0 %v867_v17, %s4037_s25  ;;  %v2282_v15 = vcombine.high %v2264_v42, %v5663_v12  ;;  %v2348_v17 = vrot.slane %v2334_v26, %v4472_v9  ;;  %v4668_v26 = vrot.slane %v1621_v36, %v4472_v9 }
 0x23b   : > { %5681 = vst [vmem:[#allocation5_spill] sm:$0xff] %v4668_v26 }
 0x23d   : > { %1658 = vrot.lane.b32.xlu1 %v1568_v16, %s4035_s23  ;;  %1646 = vrot.lane.b32.xlu0 %v1552_v18, %s4035_s23 }
 0x23f   : > { %v4524_v27 = vpop.permute.xlu0 %1021 }
 0x241   : > { %979 = vrot.lane.b32.xlu1 %v933_v28, %s4035_s23  ;;  %2370 = vrot.lane.b32.xlu0 %v2280_v29, %s4035_s23  ;;  %v1636_v28 = vrot.slane %v1622_v0, %v4472_v9  ;;  %v2332_v29 = vrot.slane %v2318_v31, %v4472_v9  ;;  %v1639_v31 = vcombine.high %v4668_v26, %v5663_v12 }
 0x243   : > { %v4536_v30 = vpop.permute.xlu0 %1273  ;;  %v1640_v25 = vcombine.high %v1636_v28, %v5663_v12 }
 0x245   : > { %2358 = vrot.lane.b32.xlu1 %v2264_v42, %s4035_s23  ;;  %967 = vrot.lane.b32.xlu0 %v917_v43, %s4035_s23  ;;  %v4674_v42 = vrot.slane %v1605_v20, %v4472_v9  ;;  %v2350_v20 = vcombine.high %v2332_v29, %v5663_v12 }
 0x247   : > { %v4560_v59 = vpop.permute.xlu0 %1023  ;;  %v4562_v62 = vpop.permute.xlu1 %1029  ;;  %5682 = vst [vmem:[#allocation6_spill] sm:$0xff] %v4674_v42  ;;  %v1637_v14 = vcombine.high %v4674_v42, %v5663_v12 }
 0x248   : > { %v1046_v37 = vcombine.high %v4524_v27, %v4562_v62 }
 0x249   : > { %1654 = vrot.lane.b32.xlu1 %v1571_v1, %s4036_s24  ;;  %1642 = vrot.lane.b32.xlu0 %v1569_v34, %s4036_s24  ;;  %v1638_v34 = vcombine.high %v1620_v61, %v5663_v12 }
 0x24a   : > { %v1060_v19 = vrot.slane %v1046_v37, %v4234_v4 }
 0x24b   : > { %v4576_v38 = vpop.permute.xlu0 %1973  ;;  %v4578_v39 = vpop.permute.xlu1 %1277 }
 0x24d   : > { %1662 = vrot.lane.b32.xlu1 %v1572_v49, %s4037_s25  ;;  %975 = vrot.lane.b32.xlu0 %v936_v53, %s4036_s24  ;;  %v4705_v49 = vrot.slane %v2333_v60, %v4472_v9 }
 0x24f   : > { %v4591_v41 = vpop.permute.xlu0 %2433  ;;  %v4593_v58 = vpop.permute.xlu1 %1027  ;;  %5686 = vst [vmem:[#allocation10_spill] sm:$0xff] %v4705_v49 }
 0x251   : > { %1650 = vrot.lane.b32.xlu1 %v1570_v2, %s4037_s25  ;;  %963 = vrot.lane.b32.xlu0 %v934_v3, %s4036_s24  ;;  %v2351_v3 = vcombine.high %v4705_v49, %v5663_v12 }
 0x253   : > { %v4606_v57 = vpop.permute.xlu0 %1275  ;;  %v4608_v5 = vpop.permute.xlu1 %1977 }
 0x255   : > { %2366 = vrot.lane.b32.xlu1 %v2283_v6, %s4036_s24  ;;  %2374 = vrot.lane.b32.xlu0 %v2284_v11, %s4037_s25  ;;  %v4716_v6 = vrot.slane %v2317_v44, %v4472_v9 }
 0x257   : > { %v4621_v47 = vpop.permute.xlu0 %1733  ;;  %v4623_v13 = vpop.permute.xlu1 %2437  ;;  %5688 = vst [vmem:[#allocation12_spill] sm:$0xff] %v4716_v6  ;;  %v2349_v11 = vcombine.high %v4716_v6, %v5663_v12 }
 0x259   : > { %2354 = vrot.lane.b32.xlu1 %v2281_v50, %s4036_s24  ;;  %971 = vrot.lane.b32.xlu0 %v935_v7, %s4037_s25  ;;  %v1045_v7 = vcombine.low %v4524_v27, %v4562_v62 }
 0x25b   : > { %v4630_v51 = vpop.permute.xlu0 %2685  ;;  %v4632_v56 = vpop.permute.xlu1 %1279  ;;  %v1053_v62 = vrot.slane %v1045_v7, %v4234_v4 }
 0x25d   : > { %983 = vrot.lane.b32.xlu1 %v937_v8, %s4037_s25  ;;  %1670 = vrot.lane.b32.xlu0 %v1620_v61, %s4035_s23 }
 0x25f   : > { %v4641_v22 = vpop.permute.xlu0 %1281  ;;  %v4643_v23 = vpop.permute.xlu1 %1737 }
 0x260   : > { %v1298_v44 = vcombine.high %v4536_v30, %v4641_v22 }
 0x261   : > { %2362 = vrot.lane.b32.xlu1 %v2282_v15, %s4037_s25  ;;  %2394 = vrot.lane.b32.xlu0 %v2348_v17, %s4035_s23  ;;  %v2352_v15 = vcombine.high %v2348_v17, %v5663_v12 }
 0x263   : > { %v4652_v16 = vpop.permute.xlu0 %1975  ;;  %v4654_v18 = vpop.permute.xlu1 %2689 }
 0x265   : > { %1682 = vrot.lane.b32.xlu1 %v1636_v28, %s4035_s23  ;;  %2382 = vrot.lane.b32.xlu0 %v2332_v29, %s4035_s23 }
 0x267   : > { %v4678_v0 = vpop.permute.xlu0 %2435  ;;  %v4680_v43 = vpop.permute.xlu1 %1979 }
 0x269   : > { %1678 = vrot.lane.b32.xlu1 %v1639_v31, %s4036_s24  ;;  %1666 = vrot.lane.b32.xlu0 %v1637_v14, %s4036_s24  ;;  %v1297_v31 = vcombine.low %v4536_v30, %v4641_v22 }
 0x26b   : > { %v4688_v32 = vpop.permute.xlu0 %1735  ;;  %v4690_v33 = vpop.permute.xlu1 %2439 }
 0x26c   : > { %5683 = vst [vmem:[#allocation7_spill] sm:$0xff] %v4688_v32 }
 0x26d   : > { %1686 = vrot.lane.b32.xlu1 %v1640_v25, %s4037_s25  ;;  %2386 = vrot.lane.b32.xlu0 %v2350_v20, %s4037_s25  ;;  %v1312_v25 = vrot.slane %v1298_v44, %v4234_v4 }
 0x26f   : > { %v4696_v36 = vpop.permute.xlu0 %2687  ;;  %v4698_v1 = vpop.permute.xlu1 %1739 }
 0x270   : > { %5684 = vst [vmem:[#allocation8_spill] sm:$0xff] %v4696_v36  ;;  %5685 = vst [vmem:[#allocation9_spill] sm:$0xff] %v4698_v1 }
 0x271   : > { %1674 = vrot.lane.b32.xlu1 %v1638_v34, %s4037_s25 }
 0x273   : > { %v1026_v53 = vpop.permute.xlu0 %1025  ;;  %v4708_v2 = vpop.permute.xlu1 %2691 }
 0x274   : > { %5687 = vst [vmem:[#allocation11_spill] sm:$0xff] %v4708_v2 }
 0x275   : > { %2390 = vrot.lane.b32.xlu1 %v2351_v3, %s4036_s24 }
 0x277   : > { %v1034_v48 = vpop.permute.xlu1 %1033  ;;  %v4721_v60 = vpop.permute.xlu0 %1031 }
 0x278   : > { %v1061_v24 = vcombine.low %v1026_v53, %v1034_v48  ;;  %v1062_v50 = vcombine.high %v1026_v53, %v1034_v48  ;;  %v1305_v48 = vrot.slane %v1297_v31, %v4234_v4 }
 0x279   : > { %2378 = vrot.lane.b32.xlu1 %v2349_v11, %s4036_s24 }
 0x27a   : > { %v1076_v55 = vrot.slane %v1062_v50, %v4234_v4  ;;  %v1069_v8 = vrot.slane %v1061_v24, %v4234_v4 }
 0x27b   : > { %v1286_v10 = vpop.permute.xlu1 %1285  ;;  %v4733_v61 = vpop.permute.xlu0 %1981 }
 0x27c   : > { %v1313_v28 = vcombine.low %v4578_v39, %v1286_v10  ;;  %v1314_v27 = vcombine.high %v4578_v39, %v1286_v10  ;;  %v1094_v29 = vcombine.high %v1060_v19, %v1076_v55  ;;  %v1093_v20 = vcombine.low %v1060_v19, %v1076_v55 }
 0x27d   : > { %2398 = vrot.lane.b32.xlu1 %v2352_v15, %s4037_s25  ;;  %v1078_v39 = vcombine.high %v1053_v62, %v1069_v8  ;;  %v1077_v30 = vcombine.low %v1053_v62, %v1069_v8 }
 0x27e   : > { %v1328_v14 = vrot.slane %v1314_v27, %v4234_v4  ;;  %v1108_v53 = vrot.slane %v1094_v29, %v4472_v9  ;;  %v1321_v3 = vrot.slane %v1313_v28, %v4234_v4  ;;  %v4759_v7 = vrot.slane %v1093_v20, %v4472_v9 }
 0x27f   : > { %v4744_v34 = vpop.permute.xlu1 %1035  ;;  %v4746_v17 = vpop.permute.xlu0 %2441  ;;  %v1092_v50 = vrot.slane %v1078_v39, %v4472_v9  ;;  %v4768_v15 = vrot.slane %v1077_v30, %v4472_v9 }
 0x280   : > { %v1346_v37 = vcombine.high %v1312_v25, %v1328_v14  ;;  %5689 = vst [vmem:[#allocation13_spill] sm:$0xff] %v4759_v7  ;;  %v1345_v55 = vcombine.low %v1312_v25, %v1328_v14  ;;  %v1330_v19 = vcombine.high %v1305_v48, %v1321_v3  ;;  %v1111_v8 = vcombine.high %v4759_v7, %v5663_v12 }
 0x281   : > { %1198 = vrot.lane.b32.xlu1 %v1108_v53, %s4035_s23  ;;  %5690 = vst [vmem:[#allocation14_spill] sm:$0xff] %v4768_v15  ;;  %v1329_v28 = vcombine.low %v1305_v48, %v1321_v3  ;;  %v1109_v14 = vcombine.high %v4768_v15, %v5663_v12  ;;  %v1998_v3 = vcombine.high %v4576_v38, %v4733_v61 }
 0x282   : > { %v1360_v24 = vrot.slane %v1346_v37, %v4472_v9  ;;  %v1344_v27 = vrot.slane %v1330_v19, %v4472_v9  ;;  %v4772_v62 = vrot.slane %v1345_v55, %v4472_v9  ;;  %v1130_v37 = vcombine.high %v4593_v58, %v4744_v34 }
 0x283   : > { %v4752_v22 = vpop.permute.xlu1 %1985  ;;  %v4754_v11 = vpop.permute.xlu0 %1283  ;;  %v4787_v39 = vrot.slane %v1329_v28, %v4472_v9  ;;  %v1112_v55 = vcombine.high %v1108_v53, %v5663_v12 }
 0x284   : > { %1450 = vrot.lane.b32.xlu0 %v1360_v24, %s4035_s23  ;;  %5691 = vst [vmem:[#allocation15_spill] sm:$0xff] %v4772_v62  ;;  %v2014_v25 = vcombine.high %v4608_v5, %v4752_v22  ;;  %v1363_v20 = vcombine.high %v4772_v62, %v5663_v12  ;;  %v2458_v62 = vcombine.high %v4591_v41, %v4746_v17 }
 0x285   : > { %1186 = vrot.lane.b32.xlu1 %v1092_v50, %s4035_s23  ;;  %5692 = vst [vmem:[#allocation16_spill] sm:$0xff] %v4787_v39  ;;  %v1361_v28 = vcombine.high %v4787_v39, %v5663_v12  ;;  %v4816_v53 = vrot.slane %v1130_v37, %v4234_v4  ;;  %v5693_v39 = vmov 0.0  }
 0x286   : > { %v4801_v19 = vrot.slane %v2014_v25, %v4234_v4  ;;  %v1110_v7 = vcombine.high %v1092_v50, %v5693_v39  ;;  %v1362_v37 = vcombine.high %v1344_v27, %v5693_v39  ;;  %v1113_v50 = vcombine.low %v4560_v59, %v4721_v60 }
 0x287   : > { %v2446_v44 = vpop.permute.xlu1 %2445  ;;  %v4763_v10 = vpop.permute.xlu0 %1741 }
 0x288   : > { %1194 = vrot.lane.b32.xlu0 %v1111_v8, %s4036_s24  ;;  %v2474_v8 = vcombine.high %v4623_v13, %v2446_v44  ;;  %v2473_v25 = vcombine.low %v4623_v13, %v2446_v44  ;;  %v2457_v13 = vcombine.low %v4591_v41, %v4746_v17  ;;  %v1364_v41 = vcombine.high %v1360_v24, %v5693_v39 }
 0x289   : > { %1438 = vrot.lane.b32.xlu1 %v1344_v27, %s4035_s23  ;;  %v2013_v17 = vcombine.low %v4608_v5, %v4752_v22  ;;  %v1366_v24 = vcombine.high %v4606_v57, %v4754_v11  ;;  %v1997_v5 = vcombine.low %v4576_v38, %v4733_v61 }
 0x28a   : > { %v4829_v6 = vrot.slane %v2474_v8, %v4234_v4 }
 0x28b   : > { %v4776_v29 = vpop.permute.xlu1 %1287  ;;  %v4778_v31 = vpop.permute.xlu0 %2693  ;;  %v4896_v61 = vrot.slane %v2013_v17, %v4234_v4  ;;  %v1758_v17 = vcombine.high %v4621_v47, %v4763_v10 }
 0x28c   : > { %1182 = vrot.lane.b32.xlu0 %v1109_v14, %s4036_s24  ;;  %v1114_v14 = vcombine.high %v4560_v59, %v4721_v60  ;;  %v1382_v44 = vcombine.high %v4632_v56, %v4776_v29  ;;  %v1381_v22 = vcombine.low %v4632_v56, %v4776_v29 }
 0x28d   : > { %1446 = vrot.lane.b32.xlu1 %v1363_v20, %s4036_s24  ;;  %v4810_v20 = vrot.slane %v1998_v3, %v4234_v4  ;;  %v1129_v3 = vcombine.low %v4593_v58, %v4744_v34  ;;  %v4841_v58 = vrot.slane %v2458_v62, %v4234_v4  ;;  %v4845_v34 = vrot.slane %v2473_v25, %v4234_v4 }
 0x28e   : > { %v4873_v25 = vrot.slane %v1113_v50, %v4234_v4 }
 0x28f   : > { %v4795_v48 = vpop.permute.xlu1 %1745  ;;  %v4797_v30 = vpop.permute.xlu0 %1983  ;;  %v4857_v60 = vrot.slane %v1129_v3, %v4234_v4  ;;  %v4882_v3 = vrot.slane %v1382_v44, %v4234_v4  ;;  %v1365_v44 = vcombine.low %v4606_v57, %v4754_v11 }
 0x290   : > { %1202 = vrot.lane.b32.xlu0 %v1112_v55, %s4037_s25  ;;  %v2046_v55 = vcombine.high %v4810_v20, %v4801_v19  ;;  %v1774_v56 = vcombine.high %v4643_v23, %v4795_v48  ;;  %v1773_v11 = vcombine.low %v4643_v23, %v4795_v48  ;;  %v1757_v48 = vcombine.low %v4621_v47, %v4763_v10 }
 0x291   : > { %1434 = vrot.lane.b32.xlu1 %v1361_v28, %s4036_s24  ;;  %v4833_v28 = vrot.slane %v1114_v14, %v4234_v4  ;;  %v4867_v14 = vrot.slane %v2457_v13, %v4234_v4  ;;  %v1146_v38 = vcombine.high %v4873_v25, %v4857_v60  ;;  %v4940_v23 = vrot.slane %v1365_v44, %v4234_v4 }
 0x292   : > { %v4864_v62 = vrot.slane %v2046_v55, %v4472_v9  ;;  %v4932_v36 = vrot.slane %v1774_v56, %v4234_v4  ;;  %v2709_v56 = vcombine.low %v4630_v51, %v4778_v31  ;;  %v4956_v44 = vrot.slane %v1773_v11, %v4234_v4 }
 0x293   : > { %v4819_v15 = vpop.permute.xlu1 %2697  ;;  %v4821_v12 = vpop.permute.xlu0 %2443  ;;  %v1162_v59 = vcombine.high %v4833_v28, %v4816_v53  ;;  %v2490_v50 = vcombine.high %v4867_v14, %v4845_v34  ;;  %v4974_v11 = vrot.slane %v1757_v48, %v4234_v4 }
 0x294   : > { %1190 = vrot.lane.b32.xlu0 %v1110_v7, %s4037_s25  ;;  %v2506_v7 = vcombine.high %v4841_v58, %v4829_v6  ;;  %v2726_v47 = vcombine.high %v4654_v18, %v4819_v15 }
 0x295   : > { %1442 = vrot.lane.b32.xlu1 %v1362_v37, %s4037_s25  ;;  %v4889_v13 = vrot.slane %v1162_v59, %v4472_v9  ;;  %v4911_v59 = vrot.slane %v1997_v5, %v4234_v4  ;;  %v4927_v5 = vrot.slane %v2490_v50, %v4472_v9  ;;  %v4947_v50 = vrot.slane %v1758_v17, %v4234_v4 }
 0x296   : > { %v4901_v29 = vrot.slane %v2506_v7, %v4472_v9  ;;  %v4918_v7 = vrot.slane %v1381_v22, %v4234_v4  ;;  %v2725_v22 = vcombine.low %v4654_v18, %v4819_v15  ;;  %v2710_v18 = vcombine.high %v4630_v51, %v4778_v31 }
 0x297   : > { %v4849_v27 = vpop.permute.xlu1 %1987  ;;  %v4851_v8 = vpop.permute.xlu0 %1743  ;;  %v2030_v42 = vcombine.high %v4911_v59, %v4896_v61  ;;  %v1806_v2 = vcombine.high %v4947_v50, %v4932_v36  ;;  %v4981_v15 = vrot.slane %v2709_v56, %v4234_v4  ;;  %v2505_v31 = vcombine.low %v4841_v58, %v4829_v6 }
 0x298   : > { %5694 = vst [vmem:[#allocation17_spill] sm:$0xff] %v4851_v8  ;;  %1454 = vrot.lane.b32.xlu0 %v1364_v41, %s4037_s25  ;;  %v4906_v41 = vrot.slane %v1366_v24, %v4234_v4  ;;  %v4968_v32 = vrot.slane %v2725_v22, %v4234_v4  ;;  %v1161_v6 = vcombine.low %v4833_v28, %v4816_v53 }
 0x299   : > { %2150 = vrot.lane.b32.xlu1 %v4864_v62, %s4035_s23  ;;  %v4971_v8 = vrot.slane %v2030_v42, %v4472_v9  ;;  %v1790_v42 = vcombine.high %v4974_v11, %v4956_v44 }
 0x29a   : > { %v1414_v57 = vcombine.high %v4906_v41, %v4882_v3  ;;  %v2742_v56 = vcombine.high %v4981_v15, %v4968_v32 }
 0x29b   : > { %v4884_v55 = vpop.permute.xlu1 %2447  ;;  %v4886_v37 = vpop.permute.xlu0 %2695  ;;  %5697 = vst [vmem:[#allocation20_spill] sm:$0xff] %v4971_v8 }
 0x29c   : > { %5695 = vst [vmem:[#allocation18_spill] sm:$0xff] %v4886_v37  ;;  %1222 = vrot.lane.b32.xlu0 %v4889_v13, %s4035_s23  ;;  %v4937_v37 = vrot.slane %v1146_v38, %v4472_v9  ;;  %v1398_v38 = vcombine.high %v4940_v23, %v4918_v7  ;;  %v4963_v17 = vrot.slane %v1414_v57, %v4472_v9 }
 0x29d   : > { %2610 = vrot.lane.b32.xlu1 %v4901_v29, %s4035_s23  ;;  %v4988_v57 = vrot.slane %v2726_v47, %v4234_v4  ;;  %v5003_v47 = vrot.slane %v2710_v18, %v4234_v4 }
 0x29e   : > { %v4991_v51 = vrot.slane %v1398_v38, %v4472_v9  ;;  %v1145_v38 = vcombine.low %v4873_v25, %v4857_v60  ;;  %v5020_v60 = vrot.slane %v1790_v42, %v4472_v9  ;;  %v5040_v42 = vrot.slane %v1161_v6, %v4472_v9 }
 0x29f   : > { %v4924_v24 = vpop.permute.xlu1 %1747  ;;  %v944_v49 = vpop.permute.xlu0 %943 }
 0x2a0   : > { %2598 = vrot.lane.b32.xlu0 %v4927_v5, %s4035_s23 }
 0x2a1   : > { %1210 = vrot.lane.b32.xlu1 %v4937_v37, %s4035_s23 }
 0x2a3   : > { %v4960_v10 = vpop.permute.xlu1 %2699  ;;  %v952_v26 = vpop.permute.xlu0 %951 }
 0x2a4   : > { %5696 = vst [vmem:[#allocation19_spill] sm:$0xff] %v4960_v10  ;;  %1474 = vrot.lane.b32.xlu0 %v4963_v17, %s4035_s23  ;;  %v992_v58 = vsel %vm986_vm4, %v4486_v21, %v952_v26  ;;  %v5025_v21 = vrot.slane %v2742_v56, %v4472_v9  ;;  %v5028_v26 = vrot.slane %v2505_v31, %v4472_v9 }
 0x2a5   : > { %2138 = vrot.lane.b32.xlu1 %v4971_v8, %s4035_s23  ;;  %v5000_v8 = vrot.slane %v1806_v2, %v4472_v9  ;;  %v5047_v56 = vrot.slane %v1145_v38, %v4472_v9 }
 0x2a6   : > { %v2523_v31 = vcombine.high %v5028_v26, %v5693_v39 }
 0x2a7   : > { %v956_v22 = vpop.permute.xlu1 %955  ;;  %v940_v48 = vpop.permute.xlu0 %939  ;;  %v1177_v38 = vcombine.high %v5047_v56, %v5693_v39 }
 0x2a8   : > { %v987_v10 = vsel %vm986_vm4, %v4497_v63, %v940_v48  ;;  %1462 = vrot.lane.b32.xlu0 %v4991_v51, %s4035_s23  ;;  %v2758_v63 = vcombine.high %v5003_v47, %v4988_v57  ;;  %v993_v2 = vsel %vm988_vm5, %v992_v58, %v956_v22  ;;  %v1413_v22 = vcombine.low %v4906_v41, %v4882_v3 }
 0x2a9   : > { %1910 = vrot.lane.b32.xlu1 %v5000_v8, %s4035_s23  ;;  %v989_v48 = vsel %vm988_vm5, %v987_v10, %v944_v49  ;;  %v2045_v49 = vcombine.low %v4810_v20, %v4801_v19  ;;  %v2029_v19 = vcombine.low %v4911_v59, %v4896_v61  ;;  %v1179_v3 = vcombine.high %v5040_v42, %v5693_v39 }
 0x2aa   : > { %v5064_v58 = vrot.slane %v1413_v22, %v4472_v9  ;;  %v2489_v61 = vcombine.low %v4867_v14, %v4845_v34 }
 0x2ab   : > { %v960_v18 = vpop.permute.xlu1 %959  ;;  %v948_v1 = vpop.permute.xlu0 %947  ;;  %v5059_v41 = vrot.slane %v2045_v49, %v4472_v9 }
 0x2ac   : > { %v994_v53 = vsel %vm990_vm6, %v993_v2, %v960_v18  ;;  %v991_v28 = vsel %vm990_vm6, %v989_v48, %v948_v1  ;;  %1898 = vrot.lane.b32.xlu0 %v5020_v60, %s4035_s23  ;;  %v5037_v1 = vrot.slane %v2758_v63, %v4472_v9  ;;  %v5075_v18 = vrot.slane %v2029_v19, %v4472_v9 }
 0x2ad   : > { %1002 = vst [vmem:[#allocation3 + $0x8] sm:$0xf] %v994_v53  ;;  %1001 = vst [vmem:[#allocation3] sm:$0xf] %v991_v28  ;;  %2850 = vrot.lane.b32.xlu1 %v5025_v21, %s4035_s23  ;;  %v2063_v2 = vcombine.high %v5059_v41, %v5693_v39  ;;  %v1397_v48 = vcombine.low %v4940_v23, %v4918_v7  ;;  %v1431_v53 = vcombine.high %v5064_v58, %v5693_v39 }
 0x2ae   : > { %v2061_v28 = vcombine.high %v5075_v18, %v5693_v39  ;;  %v5086_v49 = vrot.slane %v2489_v61, %v4472_v9  ;;  %v2524_v7 = vcombine.high %v4901_v29, %v5693_v39 }
 0x2af   : > { %v1659_v25 = vpop.permute.xlu1 %1658  ;;  %v1647_v10 = vpop.permute.xlu0 %1646  ;;  %v5093_v23 = vrot.slane %v1397_v48, %v4472_v9 }
 0x2b0   : > { %2862 = vrot.lane.b32.xlu0 %v5037_v1, %s4035_s23 }
 0x2b1   : > { %2606 = vrot.lane.b32.xlu1 %v2523_v31, %s4036_s24  ;;  %v1805_v31 = vcombine.low %v4947_v50, %v4932_v36  ;;  %v1180_v36 = vcombine.high %v4889_v13, %v5693_v39 }
 0x2b3   : > { %v5054_v20 = vpop.permute.xlu1 %979  ;;  %v2371_v6 = vpop.permute.xlu0 %2370 }
 0x2b4   : > { %1218 = vrot.lane.b32.xlu0 %v1179_v3, %s4036_s24 }
 0x2b5   : > { %1206 = vrot.lane.b32.xlu1 %v1177_v38, %s4036_s24 }
 0x2b7   : > { %v5070_v59 = vpop.permute.xlu1 %2358  ;;  %v968_v63 = vpop.permute.xlu0 %967 }
 0x2b8   : > { %2146 = vrot.lane.b32.xlu0 %v2063_v2, %s4036_s24  ;;  %v1429_v2 = vcombine.high %v5093_v23, %v5693_v39 }
 0x2b9   : > { %1470 = vrot.lane.b32.xlu1 %v1431_v53, %s4036_s24 }
 0x2bb   : > { %v1655_v34 = vpop.permute.xlu1 %1654  ;;  %v1643_v14 = vpop.permute.xlu0 %1642 }
 0x2bc   : > { %v1692_v22 = vsel %vm986_vm4, %v4550_v45, %v1655_v34  ;;  %2134 = vrot.lane.b32.xlu0 %v2061_v28, %s4036_s24  ;;  %v2521_v45 = vcombine.high %v5086_v49, %v5693_v39  ;;  %v1689_v29 = vsel %vm986_vm4, %v4556_v54, %v1643_v14  ;;  %v5113_v54 = vrot.slane %v1805_v31, %v4472_v9 }
 0x2bd   : > { %2614 = vrot.lane.b32.xlu1 %v2524_v7, %s4037_s25  ;;  %v1693_v19 = vsel %vm988_vm5, %v1692_v22, %v1659_v25  ;;  %v1690_v25 = vsel %vm988_vm5, %v1689_v29, %v1647_v10  ;;  %v2522_v34 = vcombine.high %v4927_v5, %v5693_v39  ;;  %v1432_v5 = vcombine.high %v4963_v17, %v5693_v39 }
 0x2be   : > { %v1823_v10 = vcombine.high %v5113_v54, %v5693_v39  ;;  %v2741_v17 = vcombine.low %v4981_v15, %v4968_v32 }
 0x2bf   : > { %v1663_v3 = vpop.permute.xlu1 %1662  ;;  %v976_v38 = vpop.permute.xlu0 %975 }
 0x2c0   : > { %v1694_v61 = vsel %vm990_vm6, %v1693_v19, %v1663_v3  ;;  %2594 = vrot.lane.b32.xlu0 %v2521_v45, %s4036_s24  ;;  %v1789_v45 = vcombine.low %v4974_v11, %v4956_v44  ;;  %v2542_v44 = vcombine.high %v4690_v33, %v4884_v55 }
 0x2c1   : > { %v1706_v48 = vrot.slane %v1694_v61, 4  ;;  %1458 = vrot.lane.b32.xlu1 %v1429_v2, %s4036_s24 }
 0x2c2   : > { %v5155_v15 = vrot.slane %v1789_v45, %v4472_v9 }
 0x2c3   : > { %1714 = vst [vmem:[#allocation3 + $0x28] sm:$0xf0] %v1706_v48  ;;  %v1651_v50 = vpop.permute.xlu1 %1650  ;;  %v964_v53 = vpop.permute.xlu0 %963  ;;  %v1824_v48 = vcombine.high %v5000_v8, %v5693_v39 }
 0x2c4   : > { %v1691_v14 = vsel %vm990_vm6, %v1690_v25, %v1651_v50  ;;  %1226 = vrot.lane.b32.xlu0 %v1180_v36, %s4037_s25  ;;  %v995_v7 = vsel %vm986_vm4, %v4587_v40, %v964_v53  ;;  %v5163_v36 = vrot.slane %v2741_v17, %v4472_v9  ;;  %v2081_v25 = vcombine.low %v4680_v43, %v4849_v27 }
 0x2c5   : > { %v1705_v28 = vrot.slane %v1691_v14, 4  ;;  %2602 = vrot.lane.b32.xlu1 %v2522_v34, %s4037_s25  ;;  %v996_v40 = vsel %vm988_vm5, %v995_v7, %v968_v63  ;;  %v5178_v53 = vrot.slane %v2542_v44, %v4234_v4  ;;  %v2082_v17 = vcombine.high %v4680_v43, %v4849_v27  ;;  %v5703_v44 = vld [vmem:[#allocation11_spill] sm:$0xff] }
 0x2c6   : > { %v2773_v14 = vcombine.high %v5163_v36, %v5693_v39 }
 0x2c7   : > { %1713 = vst [vmem:[#allocation3 + $0x20] sm:$0xf0] %v1705_v28  ;;  %v2367_v13 = vpop.permute.xlu1 %2366  ;;  %v2375_v22 = vpop.permute.xlu0 %2374 }
 0x2c8   : > { %v2404_v31 = vsel %vm986_vm4, %v4602_v52, %v2367_v13  ;;  %1906 = vrot.lane.b32.xlu0 %v1823_v10, %s4036_s24  ;;  %v2064_v52 = vcombine.high %v4864_v62, %v5693_v39  ;;  %v2757_v13 = vcombine.low %v5003_v47, %v4988_v57  ;;  %v5701_v57 = vld [vmem:[#allocation7_spill] sm:$0xff] }
 0x2c9   : > { %v2405_v19 = vsel %vm988_vm5, %v2404_v31, %v2371_v6  ;;  %1478 = vrot.lane.b32.xlu1 %v1432_v5, %s4037_s25  ;;  %v998_v6 = vsel %vm986_vm4, %v4572_v35, %v976_v38  ;;  %v1178_v35 = vcombine.high %v4937_v37, %v5693_v39  ;;  %v1430_v38 = vcombine.high %v4991_v51, %v5693_v39  ;;  %v5699_v5 = vld [vmem:[#allocation20_spill] sm:$0xff] }
 0x2ca   : > { %v2406_v3 = vsel %vm990_vm6, %v2405_v19, %v2375_v22  ;;  %v999_v32 = vsel %vm988_vm5, %v998_v6, %v5054_v20  ;;  %v2526_v37 = vcombine.high %v4678_v0, %v4821_v12  ;;  %v1821_v51 = vcombine.high %v5155_v15, %v5693_v39  ;;  %v5698_v22 = vld [vmem:[#allocation9_spill] sm:$0xff] }
 0x2cb   : > { %2414 = vst [vmem:[#allocation3 + $0x68] sm:$0xf] %v2406_v3  ;;  %v2355_v29 = vpop.permute.xlu1 %2354  ;;  %v972_v61 = vpop.permute.xlu0 %971  ;;  %v1842_v10 = vcombine.high %v5698_v22, %v4924_v24  ;;  %v2062_v19 = vcombine.high %v5699_v5, %v5693_v39  ;;  %v5199_v3 = vrot.slane %v2081_v25, %v4234_v4 }
 0x2cc   : > { %v997_v2 = vsel %vm990_vm6, %v996_v40, %v972_v61  ;;  %2154 = vrot.lane.b32.xlu0 %v2064_v52, %s4037_s25  ;;  %v2401_v8 = vsel %vm986_vm4, %v4617_v46, %v2355_v29  ;;  %v5187_v28 = vrot.slane %v2526_v37, %v4234_v4  ;;  %v2774_v29 = vcombine.high %v5025_v21, %v5693_v39  ;;  %v5700_v40 = vld [vmem:[#allocation17_spill] sm:$0xff]  ;;  %v5706_v37 = vld [vmem:[#allocation8_spill] sm:$0xff] }
 0x2cd   : > { %1003 = vst [vmem:[#allocation3 + $0x10] sm:$0xf] %v997_v2  ;;  %1914 = vrot.lane.b32.xlu1 %v1824_v48, %s4037_s25  ;;  %v2402_v20 = vsel %vm988_vm5, %v2401_v8, %v5070_v59  ;;  %v2065_v59 = vcombine.low %v4652_v16, %v4797_v30  ;;  %v1826_v47 = vcombine.high %v5701_v57, %v5700_v40 }
 0x2ce   : > { %v2574_v45 = vcombine.high %v5187_v28, %v5178_v53  ;;  %v2066_v61 = vcombine.high %v4652_v16, %v4797_v30  ;;  %v5217_v6 = vrot.slane %v1842_v10, %v4234_v4  ;;  %v1822_v2 = vcombine.high %v5020_v60, %v5693_v39  ;;  %v5702_v30 = vld [vmem:[#allocation19_spill] sm:$0xff] }
 0x2cf   : > { %v984_v62 = vpop.permute.xlu1 %983  ;;  %v5150_v11 = vpop.permute.xlu0 %1670  ;;  %v5211_v52 = vrot.slane %v2065_v59, %v4234_v4  ;;  %v5222_v48 = vrot.slane %v2757_v13, %v4472_v9  ;;  %v5707_v13 = vld [vmem:[#allocation6_spill] sm:$0xff] }
 0x2d0   : > { %v1000_v63 = vsel %vm990_vm6, %v999_v32, %v984_v62  ;;  %1214 = vrot.lane.b32.xlu0 %v1178_v35, %s4037_s25  ;;  %v2793_v62 = vcombine.low %v5703_v44, %v5702_v30  ;;  %v5704_v32 = vld [vmem:[#allocation5_spill] sm:$0xff]  ;;  %v5231_v27 = vrot.slane %v2574_v45, %v4472_v9  ;;  %v5234_v35 = vrot.slane %v1826_v47, %v4234_v4 }
 0x2d1   : > { %1004 = vst [vmem:[#allocation3 + $0x18] sm:$0xf] %v1000_v63  ;;  %1466 = vrot.lane.b32.xlu1 %v1430_v38, %s4037_s25  ;;  %v2098_v16 = vcombine.high %v5211_v52, %v5199_v3  ;;  %v5238_v60 = vrot.slane %v2066_v61, %v4234_v4  ;;  %v5241_v63 = vrot.slane %v2082_v17, %v4234_v4  ;;  %v5705_v38 = vld [vmem:[#allocation18_spill] sm:$0xff]  ;;  %v4038_v47 = vmov 1.0  }
 0x2d2   : > { %v5255_v59 = vrot.slane %v2793_v62, %v4234_v4 }
 0x2d3   : > { %v2363_v46 = vpop.permute.xlu1 %2362  ;;  %v5171_v50 = vpop.permute.xlu0 %2394  ;;  %v2114_v45 = vcombine.high %v5238_v60, %v5241_v63 }
 0x2d4   : > { %v2403_v34 = vsel %vm990_vm6, %v2402_v20, %v2363_v46  ;;  %1894 = vrot.lane.b32.xlu0 %v1821_v51, %s4036_s24  ;;  %v2777_v20 = vcombine.low %v5706_v37, %v5705_v38  ;;  %v2541_v46 = vcombine.low %v4690_v33, %v4884_v55  ;;  %v1874_v51 = vcombine.high %v5234_v35, %v5217_v6 }
 0x2d5   : > { %2413 = vst [vmem:[#allocation3 + $0x60] sm:$0xf] %v2403_v34  ;;  %2846 = vrot.lane.b32.xlu1 %v2773_v14, %s4036_s24  ;;  %v2775_v14 = vcombine.high %v5222_v48, %v5693_v39  ;;  %v2525_v33 = vcombine.low %v4678_v0, %v4821_v12  ;;  %v1841_v12 = vcombine.low %v5698_v22, %v4924_v24 }
 0x2d6   : > { %v5275_v61 = vrot.slane %v2541_v46, %v4234_v4  ;;  %v1825_v22 = vcombine.low %v5701_v57, %v5700_v40  ;;  %v2097_v40 = vcombine.low %v5211_v52, %v5199_v3 }
 0x2d7   : > { %v1683_v7 = vpop.permute.xlu1 %1682  ;;  %v5194_v31 = vpop.permute.xlu0 %2382  ;;  %v2533_v24 = vrot.slane %v2525_v33, %v4234_v4 }
 0x2d8   : > { %2142 = vrot.lane.b32.xlu0 %v2062_v19, %s4037_s25  ;;  %v5261_v19 = vrot.slane %v2098_v16, %v4472_v9  ;;  %v5315_v46 = vrot.slane %v1825_v22, %v4234_v4 }
 0x2d9   : > { %2854 = vrot.lane.b32.xlu1 %v2774_v29, %s4037_s25  ;;  %v5270_v29 = vrot.slane %v2777_v20, %v4234_v4 }
 0x2db   : > { %v1679_v21 = vpop.permute.xlu1 %1678  ;;  %v1667_v8 = vpop.permute.xlu0 %1666  ;;  %v2810_v16 = vcombine.high %v5270_v29, %v5255_v59 }
 0x2dc   : > { %v1698_v43 = vsel %vm986_vm4, %v5704_v32, %v1679_v21  ;;  %1902 = vrot.lane.b32.xlu0 %v1822_v2, %s4037_s25  ;;  %v1695_v10 = vsel %vm986_vm4, %v5707_v13, %v1667_v8  ;;  %v2776_v21 = vcombine.high %v5037_v1, %v5693_v39  ;;  %v2573_v2 = vcombine.low %v5187_v28, %v5178_v53 }
 0x2dd   : > { %2634 = vrot.lane.b32.xlu1 %v5231_v27, %s4035_s23  ;;  %v1699_v25 = vsel %vm988_vm5, %v1698_v43, %v1683_v7  ;;  %v5708_v7 = vlaneseq  ;;  %v1696_v17 = vsel %vm988_vm5, %v1695_v10, %v5150_v11  ;;  %v5289_v32 = vrot.slane %v1874_v51, %v4472_v9 }
 0x2de   : > { %v2558_v1 = vcombine.high %v2533_v24, %v5275_v61  ;;  %v5299_v53 = vrot.slane %v1841_v12, %v4234_v4  ;;  %v2794_v28 = vcombine.high %v5703_v44, %v5702_v30  ;;  %v5304_v8 = vrot.slane %v2114_v45, %v4472_v9 }
 0x2df   : > { %v1687_v34 = vpop.permute.xlu1 %1686  ;;  %vm2911_vm7 = vcmp.lt.s32.totalorder %v5708_v7, 512  ;;  %v5309_v57 = vrot.slane %v2810_v16, %v4472_v9  ;;  %v5312_v20 = vrot.slane %v2573_v2, %v4472_v9  ;;  %v2778_v30 = vcombine.high %v5706_v37, %v5705_v38 }
 0x2e0   : > { %v1700_v5 = vsel %vm990_vm6, %v1699_v25, %v1687_v34  ;;  %2858 = vrot.lane.b32.xlu0 %v2775_v14, %s4036_s24  ;;  %2914 = vst.msk [vmem:[#allocation3 + $0x84] ss:$8 sm:$0xf] %vm2911_vm7, %v4038_v47  ;;  %v1858_v3 = vcombine.high %v5315_v46, %v5299_v53  ;;  %v5326_v52 = vrot.slane %v2794_v28, %v4234_v4  ;;  %v5709_v25 = vld [vmem:[#allocation10_spill] sm:$0xff]  ;;  %v5710_v14 = vld [vmem:[#allocation12_spill] sm:$0xff] }
 0x2e1   : > { %v1708_v55 = vrot.slane %v1700_v5, 4  ;;  %2162 = vrot.lane.b32.xlu1 %v5261_v19, %s4035_s23  ;;  %v2572_v51 = vrot.slane %v2558_v1, %v4472_v9  ;;  %v2591_v37 = vcombine.high %v5312_v20, %v5693_v39  ;;  %v5336_v13 = vrot.slane %v2097_v40, %v4472_v9  ;;  %v2387_v5 = vpop.permute.xlu0 %2386 }
 0x2e2   : > { %v5339_v10 = vrot.slane %v2778_v30, %v4234_v4  ;;  %v2113_v7 = vcombine.low %v5238_v60, %v5241_v63  ;;  %v2557_v60 = vcombine.low %v2533_v24, %v5275_v61  ;;  %v2592_v2 = vcombine.high %v5231_v27, %v5693_v39 }
 0x2e3   : > { %1716 = vst [vmem:[#allocation3 + $0x38] sm:$0xf0] %v1708_v55  ;;  %v1675_v0 = vpop.permute.xlu1 %1674  ;;  %v1873_v16 = vcombine.low %v5234_v35, %v5217_v6  ;;  %v2809_v35 = vcombine.low %v5270_v29, %v5255_v59  ;;  %v1857_v40 = vcombine.low %v5315_v46, %v5299_v53  ;;  %v2132_v46 = vcombine.high %v5304_v8, %v5693_v39 }
 0x2e4   : > { %v1697_v62 = vsel %vm990_vm6, %v1696_v17, %v1675_v0  ;;  %2866 = vrot.lane.b32.xlu0 %v2776_v21, %s4037_s25  ;;  %v2826_v45 = vcombine.high %v5339_v10, %v5326_v52  ;;  %v1872_v0 = vrot.slane %v1858_v3, %v4472_v9  ;;  %v2129_v17 = vcombine.high %v5336_v13, %v5693_v39 }
 0x2e5   : > { %v1707_v11 = vrot.slane %v1697_v62, 4  ;;  %1934 = vrot.lane.b32.xlu1 %v5289_v32, %s4035_s23  ;;  %v5375_v22 = vrot.slane %v2557_v60, %v4472_v9  ;;  %v5383_v6 = vrot.slane %v1873_v16, %v4472_v9  ;;  %v5399_v29 = vrot.slane %v2809_v35, %v4472_v9  ;;  %v3113_v35 = vld [vmem:[#allocation2 + $0x19] sm:$0xff] }
 0x2e6   : > { %v5360_v21 = vrot.slane %v2826_v45, %v4472_v9  ;;  %v1890_v59 = vcombine.high %v1872_v0, %v5693_v39  ;;  %v2842_v16 = vcombine.high %v5309_v57, %v5693_v39 }
 0x2e7   : > { %1715 = vst [vmem:[#allocation3 + $0x30] sm:$0xf0] %v1707_v11  ;;  %v2391_v43 = vpop.permute.xlu1 %2390  ;;  %v2590_v11 = vcombine.high %v2572_v51, %v5693_v39  ;;  %v2589_v1 = vcombine.high %v5375_v22, %v5693_v39  ;;  %v1891_v3 = vcombine.high %v5383_v6, %v5693_v39 }
 0x2e8   : > { %2174 = vrot.lane.b32.xlu0 %v5304_v8, %s4035_s23  ;;  %v2410_v34 = vsel %vm986_vm4, %v5709_v25, %v2391_v43  ;;  %v1892_v43 = vcombine.high %v5289_v32, %v5693_v39  ;;  %v2825_v8 = vcombine.low %v5339_v10, %v5326_v52 }
 0x2e9   : > { %2874 = vrot.lane.b32.xlu1 %v5309_v57, %s4035_s23  ;;  %v2411_v47 = vsel %vm988_vm5, %v2410_v34, %v5171_v50  ;;  %v5363_v50 = vrot.slane %v2113_v7, %v4472_v9  ;;  %v5407_v34 = vrot.slane %v1857_v40, %v4472_v9  ;;  %v5713_v7 = vld [vmem:[#allocation16_spill] sm:$0xff] }
 0x2eb   : > { %v2379_v44 = vpop.permute.xlu1 %2378  ;;  %v2131_v24 = vcombine.high %v5363_v50, %v5693_v39 }
 0x2ec   : > { %v2407_v38 = vsel %vm986_vm4, %v5710_v14, %v2379_v44  ;;  %2622 = vrot.lane.b32.xlu0 %v2572_v51, %s4035_s23  ;;  %v5711_v44 = vld [vmem:[#allocation13_spill] sm:$0xff]  ;;  %v5712_v14 = vld [vmem:[#allocation14_spill] sm:$0xff] }
 0x2ed   : > { %v2408_v33 = vsel %vm988_vm5, %v2407_v38, %v5194_v31  ;;  %2630 = vrot.lane.b32.xlu1 %v2591_v37, %s4036_s24 }
 0x2ee   : > { %v2409_v55 = vsel %vm990_vm6, %v2408_v33, %v2387_v5  ;;  %v2841_v33 = vcombine.high %v5399_v29, %v5693_v39 }
 0x2ef   : > { %2415 = vst [vmem:[#allocation3 + $0x70] sm:$0xf] %v2409_v55  ;;  %v2399_v12 = vpop.permute.xlu1 %2398 }
 0x2f0   : > { %v2412_v31 = vsel %vm990_vm6, %v2411_v47, %v2399_v12  ;;  %1922 = vrot.lane.b32.xlu0 %v1872_v0, %s4035_s23  ;;  %v1889_v0 = vcombine.high %v5407_v34, %v5693_v39 }
 0x2f1   : > { %2416 = vst [vmem:[#allocation3 + $0x78] sm:$0xf] %v2412_v31  ;;  %2158 = vrot.lane.b32.xlu1 %v2129_v17, %s4036_s24  ;;  %v5714_v31 = vld [vmem:[#allocation15_spill] sm:$0xff] }
 0x2f3   : > { %v1199_v63 = vpop.permute.xlu1 %1198 }
 0x2f4   : > { %2886 = vrot.lane.b32.xlu0 %v5360_v21, %s4035_s23 }
 0x2f5   : > { %2638 = vrot.lane.b32.xlu1 %v2592_v2, %s4037_s25 }
 0x2f6   : > { %v1451_v62 = vpop.permute.xlu0 %1450 }
 0x2f7   : > { %v1187_v61 = vpop.permute.xlu1 %1186 }
 0x2f8   : > { %2170 = vrot.lane.b32.xlu0 %v2131_v24, %s4036_s24 }
 0x2f9   : > { %2626 = vrot.lane.b32.xlu1 %v2590_v11, %s4037_s25  ;;  %v2130_v11 = vcombine.high %v5261_v19, %v5693_v39  ;;  %v3117_v19 = vld [vmem:[#allocation2 + $0x49] sm:$0xff] }
 0x2fa   : > { %v1195_v27 = vpop.permute.xlu0 %1194 }
 0x2fb   : > { %v1439_v28 = vpop.permute.xlu1 %1438  ;;  %v1232_v51 = vsel %vm986_vm4, %v5711_v44, %v1195_v27  ;;  %v5436_v27 = vrot.slane %v2825_v8, %v4472_v9  ;;  %v3112_v8 = vld [vmem:[#allocation2 + $0x9] sm:$0xff] }
 0x2fc   : > { %2618 = vrot.lane.b32.xlu0 %v2589_v1, %s4036_s24  ;;  %v1233_v32 = vsel %vm988_vm5, %v1232_v51, %v1199_v63 }
 0x2fd   : > { %1938 = vrot.lane.b32.xlu1 %v1892_v43, %s4037_s25 }
 0x2fe   : > { %v1183_v30 = vpop.permute.xlu0 %1182 }
 0x2ff   : > { %v1447_v25 = vpop.permute.xlu1 %1446  ;;  %v1229_v38 = vsel %vm986_vm4, %v5712_v14, %v1183_v30  ;;  %v2844_v30 = vcombine.high %v5360_v21, %v5693_v39  ;;  %v3118_v21 = vld [vmem:[#allocation2 + $0x51] sm:$0xff] }
 0x300   : > { %1930 = vrot.lane.b32.xlu0 %v1891_v3, %s4036_s24  ;;  %v1230_v47 = vsel %vm988_vm5, %v1229_v38, %v1187_v61  ;;  %v1484_v17 = vsel %vm986_vm4, %v5714_v31, %v1447_v25 }
 0x301   : > { %1926 = vrot.lane.b32.xlu1 %v1890_v59, %s4037_s25  ;;  %v1485_v10 = vsel %vm988_vm5, %v1484_v17, %v1451_v62  ;;  %v2843_v62 = vcombine.high %v5436_v27, %v5693_v39 }
 0x302   : > { %v1203_v53 = vpop.permute.xlu0 %1202 }
 0x303   : > { %v1234_v37 = vsel %vm990_vm6, %v1233_v32, %v1203_v53  ;;  %v1435_v5 = vpop.permute.xlu1 %1434  ;;  %v3114_v32 = vld [vmem:[#allocation2 + $0x21] sm:$0xff] }
 0x304   : > { %v1246_v55 = vrot.slane %v1234_v37, 4  ;;  %v1481_v45 = vsel %vm986_vm4, %v5713_v7, %v1435_v5  ;;  %2178 = vrot.lane.b32.xlu0 %v2132_v46, %s4037_s25  ;;  %v3111_v37 = vld [vmem:[#allocation2 + $0x1] sm:$0xff] }
 0x305   : > { %2870 = vrot.lane.b32.xlu1 %v2841_v33, %s4036_s24  ;;  %v1482_v63 = vsel %vm988_vm5, %v1481_v45, %v1439_v28 }
 0x306   : > { %1254 = vst [vmem:[#allocation3 + $0x8] sm:$0xf0] %v1246_v55  ;;  %v1191_v12 = vpop.permute.xlu0 %1190  ;;  %v3115_v55 = vld [vmem:[#allocation2 + $0x31] sm:$0xff] }
 0x307   : > { %v1231_v60 = vsel %vm990_vm6, %v1230_v47, %v1191_v12  ;;  %v1443_v2 = vpop.permute.xlu1 %1442 }
 0x308   : > { %v1245_v24 = vrot.slane %v1231_v60, 4  ;;  %v1483_v52 = vsel %vm990_vm6, %v1482_v63, %v1443_v2  ;;  %1918 = vrot.lane.b32.xlu0 %v1889_v0, %s4036_s24  ;;  %v3116_v0 = vld [vmem:[#allocation2 + $0x39] sm:$0xff] }
 0x309   : > { %1493 = vst [vmem:[#allocation3 + $0x20] sm:$0xf] %v1483_v52  ;;  %2878 = vrot.lane.b32.xlu1 %v2842_v16, %s4037_s25 }
 0x30a   : > { %1253 = vst [vmem:[#allocation3] sm:$0xf0] %v1245_v24  ;;  %v1455_v61 = vpop.permute.xlu0 %1454 }
 0x30b   : > { %v1486_v57 = vsel %vm990_vm6, %v1485_v10, %v1455_v61  ;;  %v5439_v1 = vpop.permute.xlu1 %2150 }
 0x30c   : > { %1494 = vst [vmem:[#allocation3 + $0x28] sm:$0xf] %v1486_v57  ;;  %2166 = vrot.lane.b32.xlu0 %v2130_v11, %s4037_s25 }
 0x30d   : > { %3131 = vrot.lane.b32.xlu1 %v3113_v35, %s4031_s21  ;;  %v2918_v25 = vld [vmem:[#allocation3 + $0x8] sm:$0xff] }
 0x30e   : > { %v1223_v28 = vpop.permute.xlu0 %1222 }
 0x30f   : > { %v2611_v43 = vpop.permute.xlu1 %2610 }
 0x310   : > { %2882 = vrot.lane.b32.xlu0 %v2843_v62, %s4036_s24  ;;  %v2921_v44 = vld [vmem:[#allocation3 + $0x20] sm:$0xff] }
 0x311   : > { %3139 = vrot.lane.b32.xlu1 %v3117_v19, %s4031_s21  ;;  %v2917_v3 = vld [vmem:[#allocation3] sm:$0xff] }
 0x312   : > { %v2599_v40 = vpop.permute.xlu0 %2598  ;;  %v3907_v46 = vpack.c.bf16 %v2921_v44, %v2917_v3 }
 0x313   : > { %v5449_v51 = vpop.permute.xlu1 %1210  ;;  %v2922_v59 = vld [vmem:[#allocation3 + $0x28] sm:$0xff] }
 0x314   : > { %2890 = vrot.lane.b32.xlu0 %v2844_v30, %s4037_s25  ;;  %v3905_v53 = vpack.c.bf16 %v2922_v59, %v2918_v25 }
 0x315   : > { %3133 = vrot.lane.b32.xlu1 %v3114_v32, %s4031_s21 }
 0x316   : > { %3906 = vmatprep.subr.bf16.mxu0 %v3905_v53  ;;  %v1475_v14 = vpop.permute.xlu0 %1474 }
 0x317   : > { %v5453_v38 = vpop.permute.xlu1 %2138  ;;  %3908 = vmatpush1.bf16.msra.mxu0 %v3907_v46 }
 0x318   : > { %3127 = vrot.lane.b32.xlu0 %v3111_v37, %s4031_s21 }
 0x319   : > { %3141 = vrot.lane.b32.xlu1 %v3118_v21, %s4031_s21 }
 0x31a   : > { %v1463_v5 = vpop.permute.xlu0 %1462 }
 0x31b   : > { %v1911_v33 = vpop.permute.xlu1 %1910 }
 0x31c   : > { %3135 = vrot.lane.b32.xlu0 %v3115_v55, %s4031_s21 }
 0x31e   : > { %v5458_v7 = vpop.permute.xlu0 %1898 }
 0x31f   : > { %v5460_v45 = vpop.permute.xlu1 %2850 }
 0x320   : > { %3129 = vrot.lane.b32.xlu0 %v3112_v8, %s4031_s21 }
 0x322   : > { %v5463_v47 = vpop.permute.xlu0 %2862 }
 0x323   : > { %v2607_v12 = vpop.permute.xlu1 %2606 }
 0x324   : > { %3137 = vrot.lane.b32.xlu0 %v3116_v0, %s4031_s21  ;;  %v2644_v2 = vsel %vm986_vm4, %v5028_v26, %v2607_v12 }
 0x325   : > { %v2645_v24 = vsel %vm988_vm5, %v2644_v2, %v2611_v43 }
 0x326   : > { %v1219_v31 = vpop.permute.xlu0 %1218 }
 0x327   : > { %v1207_v17 = vpop.permute.xlu1 %1206  ;;  %v1238_v57 = vsel %vm986_vm4, %v5040_v42, %v1219_v31 }
 0x328   : > { %v1239_v19 = vsel %vm988_vm5, %v1238_v57, %v1223_v28  ;;  %v1235_v21 = vsel %vm986_vm4, %v5047_v56, %v1207_v17 }
 0x32a   : > { %v2147_v60 = vpop.permute.xlu0 %2146 }
 0x32b   : > { %v1471_v63 = vpop.permute.xlu1 %1470 }
 0x32c   : > { %v1490_v44 = vsel %vm986_vm4, %v5064_v58, %v1471_v63 }
 0x32d   : > { %v1491_v53 = vsel %vm988_vm5, %v1490_v44, %v1475_v14 }
 0x32e   : > { %v2135_v16 = vpop.permute.xlu0 %2134 }
 0x32f   : > { %v2615_v52 = vpop.permute.xlu1 %2614 }
 0x330   : > { %v2646_v10 = vsel %vm990_vm6, %v2645_v24, %v2615_v52  ;;  %v2181_v52 = vsel %vm986_vm4, %v5075_v18, %v2135_v16 }
 0x331   : > { %v2658_v61 = vrot.slane %v2646_v10, 4 }
 0x332   : > { %v2595_v11 = vpop.permute.xlu0 %2594 }
 0x333   : > { %2666 = vst [vmem:[#allocation3 + $0x68] sm:$0xf0] %v2658_v61  ;;  %v1459_v35 = vpop.permute.xlu1 %1458  ;;  %v2641_v62 = vsel %vm986_vm4, %v5086_v49, %v2595_v11  ;;  %v2184_v49 = vsel %vm986_vm4, %v5059_v41, %v2147_v60 }
 0x334   : > { %v2642_v43 = vsel %vm988_vm5, %v2641_v62, %v2599_v40  ;;  %v2185_v58 = vsel %vm988_vm5, %v2184_v49, %v5439_v1  ;;  %v1487_v14 = vsel %vm986_vm4, %v5093_v23, %v1459_v35  ;;  %v1236_v1 = vsel %vm988_vm5, %v1235_v21, %v5449_v51 }
 0x335   : > { %v1488_v17 = vsel %vm988_vm5, %v1487_v14, %v1463_v5  ;;  %v2182_v5 = vsel %vm988_vm5, %v2181_v52, %v5453_v38 }
 0x336   : > { %v1227_v30 = vpop.permute.xlu0 %1226 }
 0x337   : > { %v1240_v26 = vsel %vm990_vm6, %v1239_v19, %v1227_v30  ;;  %v2603_v3 = vpop.permute.xlu1 %2602 }
 0x338   : > { %v1248_v25 = vrot.slane %v1240_v26, 4  ;;  %v2643_v59 = vsel %vm990_vm6, %v2642_v43, %v2603_v3 }
 0x339   : > { %v2657_v42 = vrot.slane %v2643_v59, 4 }
 0x33a   : > { %1256 = vst [vmem:[#allocation3 + $0x18] sm:$0xf0] %v1248_v25  ;;  %v1907_v32 = vpop.permute.xlu0 %1906  ;;  %v2930_v11 = vld [vmem:[#allocation3 + $0x68] sm:$0xff] }
 0x33b   : > { %2665 = vst [vmem:[#allocation3 + $0x60] sm:$0xf0] %v2657_v42  ;;  %v1479_v28 = vpop.permute.xlu1 %1478  ;;  %v1944_v46 = vsel %vm986_vm4, %v5113_v54, %v1907_v32 }
 0x33c   : > { %v1492_v40 = vsel %vm990_vm6, %v1491_v53, %v1479_v28  ;;  %v1945_v8 = vsel %vm988_vm5, %v1944_v46, %v1911_v33 }
 0x33d   : > { %1496 = vst [vmem:[#allocation3 + $0x38] sm:$0xf] %v1492_v40 }
 0x33e   : > { %v2155_v37 = vpop.permute.xlu0 %2154 }
 0x33f   : > { %v2186_v55 = vsel %vm990_vm6, %v2185_v58, %v2155_v37  ;;  %v1915_v41 = vpop.permute.xlu1 %1914 }
 0x340   : > { %v2198_v12 = vrot.slane %v2186_v55, 4  ;;  %v1946_v54 = vsel %vm990_vm6, %v1945_v8, %v1915_v41  ;;  %v5525_v41 = vld [vmem:[%s5655_s3] sm:$0xff] }
 0x341   : > { %1954 = vst [vmem:[#allocation3 + $0x48] sm:$0xf] %v1946_v54  ;;  %v2920_v63 = vld [vmem:[#allocation3 + $0x18] sm:$0xff] }
 0x342   : > { %2206 = vst [vmem:[#allocation3 + $0x48] sm:$0xf0] %v2198_v12  ;;  %v1215_v0 = vpop.permute.xlu0 %1214  ;;  %v2929_v46 = vld [vmem:[#allocation3 + $0x60] sm:$0xff] }
 0x343   : > { %v1237_v31 = vsel %vm990_vm6, %v1236_v1, %v1215_v0  ;;  %v1467_v56 = vpop.permute.xlu1 %1466 }
 0x344   : > { %v1247_v60 = vrot.slane %v1237_v31, 4  ;;  %v1489_v33 = vsel %vm990_vm6, %v1488_v17, %v1467_v56  ;;  %v2924_v2 = vld [vmem:[#allocation3 + $0x38] sm:$0xff] }
 0x345   : > { %1495 = vst [vmem:[#allocation3 + $0x30] sm:$0xf] %v1489_v33  ;;  %v3913_v23 = vpack.c.bf16 %v2924_v2, %v2920_v63 }
 0x346   : > { %1255 = vst [vmem:[#allocation3 + $0x10] sm:$0xf0] %v1247_v60  ;;  %v1895_v24 = vpop.permute.xlu0 %1894 }
 0x347   : > { %v2847_v10 = vpop.permute.xlu1 %2846  ;;  %3914 = vmatprep.subr.bf16.mxu1 %v3913_v23  ;;  %v1941_v62 = vsel %vm986_vm4, %v5155_v15, %v1895_v24 }
 0x348   : > { %v2893_v51 = vsel %vm986_vm4, %v5163_v36, %v2847_v10  ;;  %v1942_v38 = vsel %vm988_vm5, %v1941_v62, %v5458_v7 }
 0x349   : > { %v2926_v61 = vld [vmem:[#allocation3 + $0x48] sm:$0xff]  ;;  %v2894_v18 = vsel %vm988_vm5, %v2893_v51, %v5460_v45 }
 0x34a   : > { %v2143_v57 = vpop.permute.xlu0 %2142  ;;  %v3909_v35 = vpack.c.bf16 %v2930_v11, %v2926_v61 }
 0x34b   : > { %v2183_v19 = vsel %vm990_vm6, %v2182_v5, %v2143_v57  ;;  %v2855_v16 = vpop.permute.xlu1 %2854 }
 0x34c   : > { %v2197_v30 = vrot.slane %v2183_v19, 4  ;;  %v2895_v26 = vsel %vm990_vm6, %v2894_v18, %v2855_v16  ;;  %3910 = vmatprep.subr.bf16.mxu0 %v3909_v35  ;;  %v2923_v36 = vld [vmem:[#allocation3 + $0x30] sm:$0xff] }
 0x34d   : > { %2905 = vst [vmem:[#allocation3 + $0x80] sm:$0xf] %v2895_v26  ;;  %v2919_v3 = vld [vmem:[#allocation3 + $0x10] sm:$0xff] }
 0x34e   : > { %2205 = vst [vmem:[#allocation3 + $0x40] sm:$0xf0] %v2197_v30  ;;  %v1903_v43 = vpop.permute.xlu0 %1902  ;;  %v3915_v44 = vpack.c.bf16 %v2923_v36, %v2919_v3 }
 0x34f   : > { %v1943_v15 = vsel %vm990_vm6, %v1942_v38, %v1903_v43  ;;  %v2635_v25 = vpop.permute.xlu1 %2634 }
 0x350   : > { %1953 = vst [vmem:[#allocation3 + $0x40] sm:$0xf] %v1943_v15  ;;  %3916 = vmatpush1.bf16.msra.mxu1 %v3915_v44 }
 0x352   : > { %v2859_v45 = vpop.permute.xlu0 %2858 }
 0x353   : > { %v2896_v59 = vsel %vm986_vm4, %v5222_v48, %v2859_v45  ;;  %v5517_v42 = vpop.permute.xlu1 %2162 }
 0x354   : > { %v2897_v32 = vsel %vm988_vm5, %v2896_v59, %v5463_v47  ;;  %v2933_v47 = vld [vmem:[#allocation3 + $0x80] sm:$0x1f] }
 0x356   : > { %v2867_v49 = vpop.permute.xlu0 %2866 }
 0x357   : > { %v2898_v28 = vsel %vm990_vm6, %v2897_v32, %v2867_v49  ;;  %v1935_v7 = vpop.permute.xlu1 %1934  ;;  %v2925_v53 = vld [vmem:[#allocation3 + $0x40] sm:$0xff] }
 0x358   : > { %2906 = vst [vmem:[#allocation3 + $0x88] sm:$0xf] %v2898_v28  ;;  %v3911_v40 = vpack.c.bf16 %v2929_v46, %v2925_v53 }
 0x35a   : > { %3912 = vmatpush1.bf16.msra.mxu0 %v3911_v40  ;;  %v2175_v58 = vpop.permute.xlu0 %2174 }
 0x35b   : > { %v2875_v37 = vpop.permute.xlu1 %2874 }
 0x35e   : > { %v2623_v21 = vpop.permute.xlu0 %2622 }
 0x35f   : > { %v2631_v55 = vpop.permute.xlu1 %2630  ;;  %v2934_v48 = vld [vmem:[#allocation3 + $0x88] sm:$0x1f] }
 0x360   : > { %3774 = vmatprep.subr.msk.mxu0 %vm2941_vm8, %v2934_v48  ;;  %v2650_v12 = vsel %vm986_vm4, %v5312_v20, %v2631_v55 }
 0x361   : > { %3775 = vmatpush1.msk.msra.mxu0 %vm2941_vm8, %v2933_v47  ;;  %v2651_v1 = vsel %vm988_vm5, %v2650_v12, %v2635_v25 }
 0x362   : > { %v1923_v8 = vpop.permute.xlu0 %1922  ;;  %3776 = vmatmul.mubr.msk.f32.vlgmr.msra.gmra.mrb[12].mxu0 %vm2937_vm9, %v5525_v41 }
 0x363   : > { %v2159_v14 = vpop.permute.xlu1 %2158  ;;  %3429 = vmatprep.mubr.f32.mxu0 %v5693_v39 }
 0x366   : > { %v2887_v54 = vpop.permute.xlu0 %2886 }
 0x367   : > { %v2639_v0 = vpop.permute.xlu1 %2638 }
 0x368   : > { %v2652_v31 = vsel %vm990_vm6, %v2651_v1, %v2639_v0 }
 0x369   : > { %v2660_v56 = vrot.slane %v2652_v31, 4 }
 0x36a   : > { %v2171_v17 = vpop.permute.xlu0 %2170 }
 0x36b   : > { %2668 = vst [vmem:[#allocation3 + $0x78] sm:$0xf0] %v2660_v56  ;;  %v2627_v60 = vpop.permute.xlu1 %2626  ;;  %v2190_v10 = vsel %vm986_vm4, %v5363_v50, %v2171_v17 }
 0x36e   : > { %v2619_v33 = vpop.permute.xlu0 %2618 }
 0x36f   : > { %v2647_v63 = vsel %vm986_vm4, %v5375_v22, %v2619_v33  ;;  %v1939_v2 = vpop.permute.xlu1 %1938  ;;  %v2191_v22 = vsel %vm988_vm5, %v2190_v10, %v2175_v58 }
 0x370   : > { %v2648_v23 = vsel %vm988_vm5, %v2647_v63, %v2623_v21 }
 0x371   : > { %v2649_v24 = vsel %vm990_vm6, %v2648_v23, %v2627_v60 }
 0x372   : > { %v2659_v20 = vrot.slane %v2649_v24, 4  ;;  %v1931_v52 = vpop.permute.xlu0 %1930 }
 0x373   : > { %v1950_v51 = vsel %vm986_vm4, %v5383_v6, %v1931_v52  ;;  %v1927_v61 = vpop.permute.xlu1 %1926  ;;  %v2187_v6 = vsel %vm986_vm4, %v5336_v13, %v2159_v14 }
 0x374   : > { %2667 = vst [vmem:[#allocation3 + $0x70] sm:$0xf0] %v2659_v20  ;;  %v1951_v11 = vsel %vm988_vm5, %v1950_v51, %v1935_v7 }
 0x375   : > { %v1952_v5 = vsel %vm990_vm6, %v1951_v11, %v1939_v2 }
 0x376   : > { %1956 = vst [vmem:[#allocation3 + $0x58] sm:$0xf] %v1952_v5  ;;  %v2179_v57 = vpop.permute.xlu0 %2178 }
 0x377   : > { %v2192_v35 = vsel %vm990_vm6, %v2191_v22, %v2179_v57  ;;  %v2871_v62 = vpop.permute.xlu1 %2870 }
 0x378   : > { %v2200_v19 = vrot.slane %v2192_v35, 4  ;;  %v2899_v50 = vsel %vm986_vm4, %v5399_v29, %v2871_v62  ;;  %v2188_v29 = vsel %vm988_vm5, %v2187_v6, %v5517_v42 }
 0x379   : > { %v2900_v30 = vsel %vm988_vm5, %v2899_v50, %v2875_v37 }
 0x37a   : > { %2208 = vst [vmem:[#allocation3 + $0x58] sm:$0xf0] %v2200_v19  ;;  %v1919_v18 = vpop.permute.xlu0 %1918 }
 0x37b   : > { %v1947_v16 = vsel %vm986_vm4, %v5407_v34, %v1919_v18  ;;  %v2879_v26 = vpop.permute.xlu1 %2878  ;;  %v2932_v34 = vld [vmem:[#allocation3 + $0x78] sm:$0xff]  ;;  %v2931_v53 = vld [vmem:[#allocation3 + $0x70] sm:$0xff] }
 0x37c   : > { %v1948_v36 = vsel %vm988_vm5, %v1947_v16, %v1923_v8  ;;  %v2901_v3 = vsel %vm990_vm6, %v2900_v30, %v2879_v26 }
 0x37d   : > { %v1949_v38 = vsel %vm990_vm6, %v1948_v36, %v1927_v61  ;;  %2907 = vst [vmem:[#allocation3 + $0x90] sm:$0xf] %v2901_v3 }
 0x37e   : > { %1955 = vst [vmem:[#allocation3 + $0x50] sm:$0xf] %v1949_v38  ;;  %v2167_v43 = vpop.permute.xlu0 %2166 }
 0x37f   : > { %v2189_v13 = vsel %vm990_vm6, %v2188_v29, %v2167_v43  ;;  %v3132_v32 = vpop.permute.xlu1 %3131 }
 0x380   : > { %v2199_v44 = vrot.slane %v2189_v13, 4 }
 0x381   : > { %v2928_v15 = vld [vmem:[#allocation3 + $0x58] sm:$0xff] }
 0x382   : > { %2207 = vst [vmem:[#allocation3 + $0x50] sm:$0xf0] %v2199_v44  ;;  %v2883_v25 = vpop.permute.xlu0 %2882  ;;  %v3917_v45 = vpack.c.bf16 %v2932_v34, %v2928_v15 }
 0x383   : > { %v2902_v59 = vsel %vm986_vm4, %v5436_v27, %v2883_v25  ;;  %v3140_v46 = vpop.permute.xlu1 %3139 }
 0x384   : > { %3918 = vmatprep.subr.bf16.mxu1 %v3917_v45  ;;  %v2903_v49 = vsel %vm988_vm5, %v2902_v59, %v2887_v54  ;;  %v3167_v37 = vcombine.low %v3132_v32, %v3140_v46  ;;  %v3168_v21 = vcombine.high %v3132_v32, %v3140_v46  ;;  %v2935_v14 = vld [vmem:[#allocation3 + $0x90] sm:$0x1f] }
 0x386   : > { %v2891_v28 = vpop.permute.xlu0 %2890  ;;  %v3175_v12 = vrot.slane %v3167_v37, %v4234_v4  ;;  %v3182_v54 = vrot.slane %v3168_v21, %v4234_v4 }
 0x387   : > { %v2904_v7 = vsel %vm990_vm6, %v2903_v49, %v2891_v28  ;;  %v3134_v8 = vpop.permute.xlu1 %3133 }
 0x388   : > { %2908 = vst [vmem:[#allocation3 + $0x98] sm:$0xf] %v2904_v7 }
 0x389   : > { %v2927_v42 = vld [vmem:[#allocation3 + $0x50] sm:$0xff] }
 0x38a   : > { %v3128_v40 = vpop.permute.xlu0 %3127  ;;  %v3919_v58 = vpack.c.bf16 %v2931_v53, %v2927_v42  ;;  %v3347_v53 = vld [vmem:[%s5657_s5] sm:$0xff] }
 0x38b   : > { %v3142_v63 = vpop.permute.xlu1 %3141 }
 0x38c   : > { %3920 = vmatpush1.bf16.msra.mxu1 %v3919_v58  ;;  %v3235_v61 = vcombine.low %v3134_v8, %v3142_v63  ;;  %v3236_v11 = vcombine.high %v3134_v8, %v3142_v63 }
 0x38e   : > { %v3136_v55 = vpop.permute.xlu0 %3135  ;;  %v3243_v35 = vrot.slane %v3235_v61, %v4234_v4  ;;  %v3250_v62 = vrot.slane %v3236_v11, %v4234_v4 }
 0x38f   : > { %v3151_v48 = vcombine.low %v3128_v40, %v3136_v55  ;;  %v3152_v47 = vcombine.high %v3128_v40, %v3136_v55  ;;  %v2936_v27 = vld [vmem:[#allocation3 + $0x98] sm:$0x1f] }
 0x390   : > { %3777 = vmatprep.subr.msk.mxu1 %vm2941_vm8, %v2936_v27 }
 0x391   : > { %v3159_v1 = vrot.slane %v3151_v48, %v4234_v4  ;;  %v3166_v0 = vrot.slane %v3152_v47, %v4234_v4  ;;  %3778 = vmatpush1.msk.msra.mxu1 %vm2941_vm8, %v2935_v14 }
 0x392   : > { %3779 = vmatmul.mubr.msk.f32.vlgmr.msra.gmra.mrb[20].mxu1 %vm2937_vm9, %v5525_v41  ;;  %v3130_v31 = vpop.permute.xlu0 %3129 }
 0x393   : > { %v3183_v56 = vcombine.low %v3159_v1, %v3175_v12  ;;  %v3199_v17 = vcombine.low %v3166_v0, %v3182_v54  ;;  %v3184_v2 = vcombine.high %v3159_v1, %v3175_v12  ;;  %v3200_v23 = vcombine.high %v3166_v0, %v3182_v54 }
 0x394   : > { %v3101_v54 = vstv %s3096_s13 }
 0x395   : > { %v3191_v60 = vrot.slane %v3183_v56, %v4472_v9  ;;  %v3207_v33 = vrot.slane %v3199_v17, %v4472_v9  ;;  %v3214_v41 = vrot.slane %v3200_v23, %v4472_v9  ;;  %v3198_v5 = vrot.slane %v3184_v2, %v4472_v9 }
 0x396   : > { %v3138_v24 = vpop.permute.xlu0 %3137 }
 0x397   : > { %v3219_v20 = vcombine.low %v3130_v31, %v3138_v24  ;;  %v3220_v52 = vcombine.high %v3130_v31, %v3138_v24  ;;  %v3217_v10 = vcombine.high %v3207_v33, %v5693_v39  ;;  %v3215_v51 = vcombine.high %v3191_v60, %v5693_v39 }
 0x398   : > { %v3218_v19 = vcombine.high %v3214_v41, %v5693_v39  ;;  %v3216_v50 = vcombine.high %v3198_v5, %v5693_v39 }
 0x399   : > { %3300 = vrot.lane.b32.xlu0 %v3217_v10, %s4036_s24  ;;  %3288 = vrot.lane.b32.xlu1 %v3215_v51, %s4036_s24  ;;  %v3227_v22 = vrot.slane %v3219_v20, %v4234_v4  ;;  %v3234_v57 = vrot.slane %v3220_v52, %v4234_v4 }
 0x39b   : > { %v3251_v18 = vcombine.low %v3227_v22, %v3243_v35  ;;  %v3252_v6 = vcombine.high %v3227_v22, %v3243_v35  ;;  %v3267_v16 = vcombine.low %v3234_v57, %v3250_v62  ;;  %v3268_v30 = vcombine.high %v3234_v57, %v3250_v62 }
 0x39d   : > { %3304 = vrot.lane.b32.xlu0 %v3214_v41, %s4035_s23  ;;  %3292 = vrot.lane.b32.xlu1 %v3198_v5, %s4035_s23  ;;  %v3259_v26 = vrot.slane %v3251_v18, %v4472_v9  ;;  %v3275_v4 = vrot.slane %v3267_v16, %v4472_v9  ;;  %v3282_v36 = vrot.slane %v3268_v30, %v4472_v9 }
 0x39e   : > { %v3266_v3 = vrot.slane %v3252_v6, %v4472_v9 }
 0x39f   : > { %v3285_v38 = vcombine.high %v3275_v4, %v5693_v39  ;;  %v3283_v29 = vcombine.high %v3259_v26, %v5693_v39  ;;  %v3286_v43 = vcombine.high %v3282_v36, %v5693_v39 }
 0x3a0   : > { %v3284_v13 = vcombine.high %v3266_v3, %v5693_v39 }
 0x3a1   : > { %3308 = vrot.lane.b32.xlu0 %v3218_v19, %s4037_s25  ;;  %3296 = vrot.lane.b32.xlu1 %v3216_v50, %s4037_s25 }
 0x3a5   : > { %3328 = vrot.lane.b32.xlu0 %v3282_v36, %s4035_s23  ;;  %3316 = vrot.lane.b32.xlu1 %v3266_v3, %s4035_s23 }
 0x3a9   : > { %3324 = vrot.lane.b32.xlu0 %v3285_v38, %s4036_s24  ;;  %3312 = vrot.lane.b32.xlu1 %v3283_v29, %s4036_s24 }
 0x3ad   : > { %3332 = vrot.lane.b32.xlu0 %v3286_v43, %s4037_s25  ;;  %3320 = vrot.lane.b32.xlu1 %v3284_v13, %s4037_s25 }
 0x40b   : > { %v3289_v9 = vpop.permute.xlu1 %3288  ;;  %v3301_v44 = vpop.permute.xlu0 %3300 }
 0x40c   : > { %v3335_v25 = vsel %vm986_vm4, %v3191_v60, %v3289_v9  ;;  %v3338_v45 = vsel %vm986_vm4, %v3207_v33, %v3301_v44  ;;  %v3110_v33 = vld [vmem:[%s5656_s4] sm:$0xff] }
 0x40f   : > { %v3293_v15 = vpop.permute.xlu1 %3292  ;;  %v3305_v34 = vpop.permute.xlu0 %3304 }
 0x410   : > { %v3336_v59 = vsel %vm988_vm5, %v3335_v25, %v3293_v15  ;;  %v3339_v32 = vsel %vm988_vm5, %v3338_v45, %v3305_v34 }
 0x413   : > { %v3297_v49 = vpop.permute.xlu1 %3296  ;;  %v3309_v28 = vpop.permute.xlu0 %3308 }
 0x414   : > { %v3337_v7 = vsel %vm990_vm6, %v3336_v59, %v3297_v49  ;;  %v3340_v42 = vsel %vm990_vm6, %v3339_v32, %v3309_v28 }
 0x415   : > { %3780 = vmatprep.subr.msk.mxu0 %vm3352_vm10, %v3340_v42 }
 0x416   : > { %3781 = vmatpush1.msk.msra.mxu0 %vm3352_vm10, %v3337_v7 }
 0x417   : > { %v3317_v46 = vpop.permute.xlu1 %3316  ;;  %v3329_v40 = vpop.permute.xlu0 %3328  ;;  %3782 = vmatmul.mubr.msk.f32.vlgmr.msra.gmra.mrb[14].mxu0 %vm3348_vm11, %v3347_v53 }
 0x418   : > { %3500 = vmatprep.mubr.f32.mxu0 %v5693_v39 }
 0x41b   : > { %v3313_v58 = vpop.permute.xlu1 %3312  ;;  %v3325_v37 = vpop.permute.xlu0 %3324 }
 0x41c   : > { %v3341_v21 = vsel %vm986_vm4, %v3259_v26, %v3313_v58  ;;  %v3344_v55 = vsel %vm986_vm4, %v3275_v4, %v3325_v37 }
 0x41d   : > { %v3342_v48 = vsel %vm988_vm5, %v3341_v21, %v3317_v46  ;;  %v3345_v27 = vsel %vm988_vm5, %v3344_v55, %v3329_v40 }
 0x41f   : > { %v3321_v47 = vpop.permute.xlu1 %3320  ;;  %v3333_v8 = vpop.permute.xlu0 %3332 }
 0x420   : > { %v3343_v14 = vsel %vm990_vm6, %v3342_v48, %v3321_v47  ;;  %v3346_v12 = vsel %vm990_vm6, %v3345_v27, %v3333_v8 }
 0x421   : > { %3783 = vmatprep.subr.msk.mxu0 %vm3352_vm10, %v3346_v12 }
 0x422   : > { %3784 = vmatpush1.msk.msra.mxu0 %vm3352_vm10, %v3343_v14 }
 0x423   : > { %3785 = vmatmul.mubr.msk.f32.vlgmr.msra.gmra.mrb[16].mxu0 %vm3348_vm11, %v3347_v53 }
 0x424   : > { %3575 = vmatprep.mubr.f32.mxu0 %v5693_v39 }
 0x435   : > { %v3020_v1 = vpop.f32.mrb[12].mxu0 }
 0x436   : > { %vm3097_vm12 = vcmp.gt.f32.partialorder %v3020_v1, 0.0  ;;  %v3102_v0 = vmul.f32 %v3101_v54, %v3020_v1  ;;  %v3022_v31 = vpop.f32.mrb[13].mxu0 }
 0x437   : > { %vm3098_vm13 = vcmp.gt.f32.partialorder %v3022_v31, 0.0  ;;  %v3103_v56 = vmul.f32 %v3101_v54, %v3022_v31 }
 0x438   : > { %v3106_v17 = vsel %vm3097_vm12, %v3020_v1, %v3102_v0 }
 0x439   : > { %v3107_v60 = vsel %vm3098_vm13, %v3022_v31, %v3103_v56 }
 0x43a   : > { %3511 = vmatprep.subr.mxu0 %v3107_v60 }
 0x43b   : > { %3512 = vmatpush1.msra.mxu0 %v3106_v17 }
 0x43c   : > { %3786 = vmatmul.mubr.msk.f32.vlgmr.msra.gmra.mrb[14].mxu0 %vm3507_vm14, %v3110_v33 }
 0x43d   : > { %3646 = vmatprep.mubr.f32.mxu0 %v5693_v39 }
 0x465   : > { %v3091_v63 = vpop.f32.mrb[20].mxu1 }
 0x466   : > { %v3104_v2 = vmul.f32 %v3101_v54, %v3091_v63  ;;  %v3093_v23 = vpop.f32.mrb[21].mxu1  ;;  %vm3099_vm15 = vcmp.gt.f32.partialorder %v3091_v63, 0.0 }
 0x467   : > { %vm3100_vm0 = vcmp.gt.f32.partialorder %v3093_v23, 0.0  ;;  %v3105_v24 = vmul.f32 %v3101_v54, %v3093_v23 }
 0x468   : > { %v3108_v52 = vsel %vm3099_vm15, %v3091_v63, %v3104_v2 }
 0x469   : > { %v3109_v20 = vsel %vm3100_vm0, %v3093_v23, %v3105_v24 }
 0x46a   : > { %3582 = vmatprep.subr.mxu0 %v3109_v20 }
 0x46b   : > { %3583 = vmatpush1.msra.mxu0 %v3108_v52 }
 0x46c   : > { %3787 = vmatmul.mubr.msk.f32.vlgmr.msra.gmra.mrb[16].mxu0 %vm3507_vm14, %v3110_v33 }
 0x50f   : > { %v3577_v39 = vpop.f32.mrb[14].mxu0 }
 0x510   : > { %3653 = vst [vmem:[%s301_s22] sm:$0xff] %v3577_v39  ;;  %v3579_v10 = vpop.f32.mrb[15].mxu0 }
 0x511   : > { %3654 = vst [vmem:[%s301_s22 + $0x8] sm:$0xff] %v3579_v10 }
 0x53f   : > { %v3648_v51 = vpop.f32.mrb[16].mxu0 }
 0x540   : > { %3655 = vst [vmem:[%s301_s22 + $0x10] sm:$0xff] %v3648_v51  ;;  %v3650_v61 = vpop.f32.mrb[17].mxu0 }
 0x541   : > { %3656 = vst [vmem:[%s301_s22 + $0x18] sm:$0xff] %v3650_v61 }
 0x542 PF: > { %s18_s30 = sadd.s32 1, %s4026_s30   ;;  %s5715_s26 = smov %s4018_s28 }
 0x543   : > { %p15_p7 = scmp.ge.s32.totalorder %s18_s30, 6   ;;  %s5716_s27 = smov %s4022_s29 }
 0x544   : > { %s5717_s28 = smov %s5720_s6  ;;  %s5718_s29 = smov %s5724_s8 }
 0x545   :  { %17 = sbr.rel (!%p15_p7) target bundleno = 3 (0x3), region = 83 }

</bundles_post_ra>
